<compile_context>
chip_gen: v7x
topology: tpu7x:2x2x1
jax: 0.10.0
libtpu: 0.0.40
codegen_flags: <defaults>
</compile_context>

<pallas_src>
import functools

import jax
import jax.numpy as jnp
from jax.experimental import pallas as pl
from jax.experimental.pallas import tpu as pltpu

EPS = 1e-5


def _pitch_kernel(x_ref, w1_ref, b1_ref, g1_ref, be1_ref,
                  w2_ref, b2_ref, g2_ref, be2_ref,
                  lw_ref, lb_ref, out_ref, *, seq_len):
    T = seq_len
    x = x_ref[0]                       # (D, L): NB batch elements packed along lanes
    D, L = x.shape
    NB = L // T
    inv_t = 1.0 / T

    # Hoisted lane-position masks, shared by both conv layers and the LN butterfly.
    lane = jax.lax.broadcasted_iota(jnp.int32, (1, L), 1)
    pos = lane % T                     # position inside the batch segment
    keep_l = pos != 0                  # t-1 exists inside this segment
    keep_r = pos != (T - 1)            # t+1 exists inside this segment

    def conv3(h, wf_ref, b_ref):
        # Conv1d(kernel=3, padding=1) as a single fused K=3D MXU matmul.
        h_m1 = jnp.where(keep_l, pltpu.roll(h, shift=1, axis=1), 0.0)       # h[:, t-1]
        h_p1 = jnp.where(keep_r, pltpu.roll(h, shift=L - 1, axis=1), 0.0)   # h[:, t+1]
        hs = jnp.concatenate([h_m1, h, h_p1], axis=0)                       # (3D, L)
        out = jnp.dot(wf_ref[...], hs, preferred_element_type=jnp.float32)  # (D, L)
        return out + b_ref[...]                                             # bias (D, 1)

    def layernorm(h, g_ref, be_ref):
        # Per-segment LayerNorm over the time axis, single-pass stats in exact f32.
        if NB > 1:
            # Segmented all-reduce: log2(T) masked lane rotations on [h; h*h].
            z = jnp.concatenate([h, h * h], axis=0)           # (2D, L)
            k = 1
            while k < T:                                      # static unroll
                a = pltpu.roll(z, shift=k, axis=1)            # z[:, l-k]
                b = pltpu.roll(z, shift=(k - T) % L, axis=1)  # z[:, l-k+T] (wrap in seg)
                z = z + jnp.where(pos >= k, a, b)
                k *= 2
            mu = z[:D] * inv_t                                # (D, L): per-lane segment mean
            ms = z[D:] * inv_t
        else:
            mu = jnp.mean(h, axis=-1, keepdims=True)          # (D, 1)
            ms = jnp.mean(h * h, axis=-1, keepdims=True)
        var = ms - mu * mu
        inv = jax.lax.rsqrt(var + EPS)
        return (h - mu) * inv * g_ref[...] + be_ref[...]      # gamma/beta tiled (1, L)

    h = jnp.maximum(conv3(x, w1_ref, b1_ref), 0.0)
    h = layernorm(h, g1_ref, be1_ref)
    h = jnp.maximum(conv3(h, w2_ref, b2_ref), 0.0)
    h = layernorm(h, g2_ref, be2_ref)

    # Linear(dim, 1) over time for every packed batch element: block-diagonal
    # (L, NB) weight -> (D, NB) result; no transpose of h, no M=1 matmul.
    res = jnp.dot(h, lw_ref[...], preferred_element_type=jnp.float32)
    out_ref[0] = res + lb_ref[...]


def pitch_predictor(x, params):
    B, T, D = x.shape
    assert T == D, "PitchPredictor requires seq_len == dim (LayerNorm(dim) acts on the time axis)"

    # Pack NB batch elements along the lane axis (full 128-lane vregs when T | 128).
    if T < 128 and (T & (T - 1)) == 0:
        NB = 128 // T
    else:
        NB = 1            # butterfly needs power-of-two T; otherwise run unpacked
    nsteps = (B + NB - 1) // NB
    B_pad = nsteps * NB
    L = NB * T

    xt = jnp.transpose(x, (0, 2, 1))                   # (B, D, T)  NCL, as in PyTorch
    if B_pad != B:
        xt = jnp.pad(xt, ((0, B_pad - B), (0, 0), (0, 0)))
    # (B_pad, D, T) -> (nsteps, D, NB*T): lane index = local_batch * T + t
    xp = xt.reshape(nsteps, NB, D, T).transpose(0, 2, 1, 3).reshape(nsteps, D, L)

    # Fused conv weights: (D, 3D) = [W[:,:,0] | W[:,:,1] | W[:,:,2]] (taps t-1, t, t+1).
    w1f = jnp.transpose(params["w1"], (0, 2, 1)).reshape(D, 3 * D)
    w2f = jnp.transpose(params["w2"], (0, 2, 1)).reshape(D, 3 * D)
    b1 = params["b1"].reshape(D, 1)
    b2 = params["b2"].reshape(D, 1)
    g1 = jnp.tile(params["g1"].reshape(1, T), (1, NB))
    be1 = jnp.tile(params["be1"].reshape(1, T), (1, NB))
    g2 = jnp.tile(params["g2"].reshape(1, T), (1, NB))
    be2 = jnp.tile(params["be2"].reshape(1, T), (1, NB))
    # Block-diagonal Linear(dim, 1) weight: lwb[b*T + t, b] = lw[t].
    lwb = jnp.kron(jnp.eye(NB, dtype=jnp.float32), params["lw"].reshape(T, 1))   # (L, NB)
    lb = params["lb"].reshape(1, 1)

    full = lambda i: (0, 0)
    kernel = functools.partial(_pitch_kernel, seq_len=T)
    out_pk = pl.pallas_call(
        kernel,
        out_shape=jax.ShapeDtypeStruct((nsteps, D, NB), jnp.float32),
        grid=(nsteps,),
        in_specs=[
            pl.BlockSpec((1, D, L), lambda i: (i, 0, 0)),   # packed activations
            pl.BlockSpec((D, 3 * D), full),                 # fused conv1 weight
            pl.BlockSpec((D, 1), full),                     # conv1 bias
            pl.BlockSpec((1, L), full),                     # gamma1 (tiled over NB)
            pl.BlockSpec((1, L), full),                     # beta1
            pl.BlockSpec((D, 3 * D), full),                 # fused conv2 weight
            pl.BlockSpec((D, 1), full),                     # conv2 bias
            pl.BlockSpec((1, L), full),                     # gamma2
            pl.BlockSpec((1, L), full),                     # beta2
            pl.BlockSpec((L, NB), full),                    # block-diag linear weight
            pl.BlockSpec((1, 1), full),                     # linear bias
        ],
        out_specs=pl.BlockSpec((1, D, NB), lambda i: (i, 0, 0)),
        compiler_params=pltpu.CompilerParams(
            dimension_semantics=("parallel",)),             # >=2 steps -> both v7x TCs
    )(xp, w1f, b1, g1, be1, w2f, b2, g2, be2, lwb, lb)

    # (nsteps, D, NB) -> (B, 1, D): tiny wrapper-side layout plumbing.
    out = jnp.transpose(out_pk, (0, 2, 1)).reshape(B_pad, 1, D)
    return out[:B]


def ref_forward(x, p):
    """Pure-JAX reference following the PyTorch module literally."""
    y = jnp.transpose(x, (0, 2, 1))                        # (B, D, T)
    T = y.shape[-1]

    def conv1d(h, w, b):
        hp = jnp.pad(h, ((0, 0), (0, 0), (1, 1)))
        out = sum(jnp.einsum("oc,bct->bot", w[:, :, k], hp[:, :, k:k + T]) for k in range(3))
        return out + b[None, :, None]

    def layernorm(h, g, be):
        mu = jnp.mean(h, axis=-1, keepdims=True)
        var = jnp.mean((h - mu) ** 2, axis=-1, keepdims=True)
        return (h - mu) * jax.lax.rsqrt(var + EPS) * g + be

    h = jax.nn.relu(conv1d(y, p["w1"], p["b1"]))
    h = layernorm(h, p["g1"], p["be1"])
    h = jax.nn.relu(conv1d(h, p["w2"], p["b2"]))
    h = layernorm(h, p["g2"], p["be2"])
    out = jnp.einsum("bct,ot->bco", h, p["lw"]) + p["lb"]  # (B, D, 1)
    return jnp.transpose(out, (0, 2, 1))                   # (B, 1, D)


def init_params(key, dim):
    ks = jax.random.split(key, 6)
    s = 1.0 / jnp.sqrt(3.0 * dim)
    return {
        "w1": jax.random.normal(ks[0], (dim, dim, 3), jnp.float32) * s,
        "b1": jax.random.normal(ks[1], (dim,), jnp.float32) * 0.1,
        "g1": jnp.ones((dim,), jnp.float32),
        "be1": jnp.zeros((dim,), jnp.float32),
        "w2": jax.random.normal(ks[2], (dim, dim, 3), jnp.float32) * s,
        "b2": jax.random.normal(ks[3], (dim,), jnp.float32) * 0.1,
        "g2": jnp.ones((dim,), jnp.float32),
        "be2": jnp.zeros((dim,), jnp.float32),
        "lw": jax.random.normal(ks[4], (1, dim), jnp.float32) * (1.0 / jnp.sqrt(dim)),
        "lb": jax.random.normal(ks[5], (1,), jnp.float32) * 0.1,
    }


if __name__ == "__main__":
    B, DIM = 8, 32          # module requires seq_len == dim; B=8 -> 2 packed grid steps
    key = jax.random.PRNGKey(0)
    kx, kp = jax.random.split(key)
    x = jax.random.normal(kx, (B, DIM, DIM), jnp.float32)   # (B, T, D) with T == D
    params = init_params(kp, DIM)

    out = jax.block_until_ready(pitch_predictor(x, params))
    ref = jax.block_until_ready(ref_forward(x, params))

    assert out.shape == (B, 1, DIM), out.shape
    err = float(jnp.max(jnp.abs(out - ref)))
    assert jnp.allclose(out, ref, atol=1e-4, rtol=1e-4), err
    print("KERNEL_OK")
</pallas_src>

<mosaic_0001>
module attributes {stable_mosaic.version = 11 : i64} {
  func.func @_pitch_kernel(%arg0: i32, %arg1: memref<1x32x128xf32, #tpu.memory_space<vmem>>, %arg2: memref<32x96xf32, #tpu.memory_space<vmem>>, %arg3: memref<32x1xf32, #tpu.memory_space<vmem>>, %arg4: memref<1x128xf32, #tpu.memory_space<vmem>>, %arg5: memref<1x128xf32, #tpu.memory_space<vmem>>, %arg6: memref<32x96xf32, #tpu.memory_space<vmem>>, %arg7: memref<32x1xf32, #tpu.memory_space<vmem>>, %arg8: memref<1x128xf32, #tpu.memory_space<vmem>>, %arg9: memref<1x128xf32, #tpu.memory_space<vmem>>, %arg10: memref<128x4xf32, #tpu.memory_space<vmem>>, %arg11: memref<1x1xf32, #tpu.memory_space<vmem>>, %arg12: memref<1x32x4xf32, #tpu.memory_space<vmem>>) attributes {dimension_semantics = [#tpu.dimension_semantics<parallel>], iteration_bounds = array<i64: 2>, scalar_prefetch = 0 : i64, scratch_operands = 0 : i64, tpu.core_type = #tpu.core_type<tc>, window_params = [{transform_indices = @transform_0, window_bounds = array<i64: 1, 32, 128>}, {pipeline_mode = #tpu.pipeline_mode<synchronous>, transform_indices = @transform_1, window_bounds = array<i64: 32, 96>}, {pipeline_mode = #tpu.pipeline_mode<synchronous>, transform_indices = @transform_2, window_bounds = array<i64: 32, 1>}, {pipeline_mode = #tpu.pipeline_mode<synchronous>, transform_indices = @transform_3, window_bounds = array<i64: 1, 128>}, {pipeline_mode = #tpu.pipeline_mode<synchronous>, transform_indices = @transform_4, window_bounds = array<i64: 1, 128>}, {pipeline_mode = #tpu.pipeline_mode<synchronous>, transform_indices = @transform_5, window_bounds = array<i64: 32, 96>}, {pipeline_mode = #tpu.pipeline_mode<synchronous>, transform_indices = @transform_6, window_bounds = array<i64: 32, 1>}, {pipeline_mode = #tpu.pipeline_mode<synchronous>, transform_indices = @transform_7, window_bounds = array<i64: 1, 128>}, {pipeline_mode = #tpu.pipeline_mode<synchronous>, transform_indices = @transform_8, window_bounds = array<i64: 1, 128>}, {pipeline_mode = #tpu.pipeline_mode<synchronous>, transform_indices = @transform_9, window_bounds = array<i64: 128, 4>}, {pipeline_mode = #tpu.pipeline_mode<synchronous>, transform_indices = @transform_10, window_bounds = array<i64: 1, 1>}, {transform_indices = @transform_11, window_bounds = array<i64: 1, 32, 4>}]} {
    %c0 = arith.constant 0 : index
    %c0_0 = arith.constant 0 : index
    %c0_1 = arith.constant 0 : index
    %0 = vector.load %arg1[%c0, %c0_0, %c0_1] : memref<1x32x128xf32, #tpu.memory_space<vmem>>, vector<1x32x128xf32>
    %1 = vector.shape_cast %0 : vector<1x32x128xf32> to vector<32x128xf32>
    %2 = tpu.iota {dimensions = array<i32: 1>} : vector<1x128xi32>
    %c32_i32 = arith.constant 32 : i32
    %c0_i32 = arith.constant 0 : i32
    %3 = arith.cmpi eq, %c32_i32, %c0_i32 : i32
    %c1_i32 = arith.constant 1 : i32
    %4 = arith.select %3, %c1_i32, %c32_i32 : i32
    %5 = vector.broadcast %4 : i32 to vector<1x128xi32>
    %6 = arith.remsi %2, %5 : vector<1x128xi32>
    %c0_i32_2 = arith.constant 0 : i32
    %7 = vector.broadcast %c0_i32_2 : i32 to vector<1x128xi32>
    %8 = arith.cmpi ne, %6, %7 : vector<1x128xi32>
    %c0_i32_3 = arith.constant 0 : i32
    %9 = vector.broadcast %c0_i32_3 : i32 to vector<1x128xi32>
    %10 = arith.cmpi slt, %6, %9 : vector<1x128xi32>
    %c0_i32_4 = arith.constant 0 : i32
    %11 = arith.cmpi slt, %4, %c0_i32_4 : i32
    %12 = vector.broadcast %11 : i1 to vector<1x128xi1>
    %13 = vector.broadcast %12 : vector<1x128xi1> to vector<1x128xi1>
    %14 = arith.xori %10, %13 : vector<1x128xi1>
    %15 = arith.andi %14, %8 : vector<1x128xi1>
    %16 = vector.broadcast %4 : i32 to vector<1x128xi32>
    %17 = arith.addi %6, %16 : vector<1x128xi32>
    %18 = arith.select %15, %17, %6 : vector<1x128xi1>, vector<1x128xi32>
    %c0_i32_5 = arith.constant 0 : i32
    %19 = vector.broadcast %c0_i32_5 : i32 to vector<1x128xi32>
    %20 = arith.cmpi ne, %18, %19 : vector<1x128xi32>
    %c31_i32 = arith.constant 31 : i32
    %21 = vector.broadcast %c31_i32 : i32 to vector<1x128xi32>
    %22 = arith.cmpi ne, %18, %21 : vector<1x128xi32>
    %c1_i32_6 = arith.constant 1 : i32
    %23 = tpu.dynamic_rotate %1 by %c1_i32_6 dim 1 : vector<32x128xf32>, i32 -> vector<32x128xf32>
    %cst = arith.constant 0.000000e+00 : f32
    %24 = vector.shape_cast %20 : vector<1x128xi1> to vector<1x128xi1>
    %25 = vector.broadcast %24 : vector<1x128xi1> to vector<32x128xi1>
    %26 = vector.broadcast %cst : f32 to vector<32x128xf32>
    %27 = arith.select %25, %23, %26 : vector<32x128xi1>, vector<32x128xf32>
    %c127_i32 = arith.constant 127 : i32
    %28 = tpu.dynamic_rotate %1 by %c127_i32 dim 1 : vector<32x128xf32>, i32 -> vector<32x128xf32>
    %cst_7 = arith.constant 0.000000e+00 : f32
    %29 = vector.shape_cast %22 : vector<1x128xi1> to vector<1x128xi1>
    %30 = vector.broadcast %29 : vector<1x128xi1> to vector<32x128xi1>
    %31 = vector.broadcast %cst_7 : f32 to vector<32x128xf32>
    %32 = arith.select %30, %28, %31 : vector<32x128xi1>, vector<32x128xf32>
    %33 = tpu.concatenate %27, %1, %32 in 0 : vector<32x128xf32>, vector<32x128xf32>, vector<32x128xf32> -> vector<96x128xf32>
    %c0_8 = arith.constant 0 : index
    %c0_9 = arith.constant 0 : index
    %34 = vector.load %arg2[%c0_8, %c0_9] : memref<32x96xf32, #tpu.memory_space<vmem>>, vector<32x96xf32>
    %cst_10 = arith.constant dense<0.000000e+00> : vector<32x128xf32>
    %35 = tpu.matmul %34, %33, %cst_10 {dimension_numbers = #tpu.dot_dimension_numbers<[1], [0], [0], [1], [0, 0, 1, 1], [], []>} : vector<32x96xf32>, vector<96x128xf32>, vector<32x128xf32> -> vector<32x128xf32>
    %c0_11 = arith.constant 0 : index
    %c0_12 = arith.constant 0 : index
    %36 = vector.load %arg3[%c0_11, %c0_12] : memref<32x1xf32, #tpu.memory_space<vmem>>, vector<32x1xf32>
    %37 = vector.broadcast %36 : vector<32x1xf32> to vector<32x128xf32>
    %38 = arith.addf %35, %37 : vector<32x128xf32>
    %cst_13 = arith.constant 0.000000e+00 : f32
    %39 = vector.broadcast %cst_13 : f32 to vector<32x128xf32>
    %40 = arith.maximumf %38, %39 : vector<32x128xf32>
    %41 = arith.mulf %40, %40 : vector<32x128xf32>
    %42 = tpu.concatenate %40, %41 in 0 : vector<32x128xf32>, vector<32x128xf32> -> vector<64x128xf32>
    %c1_i32_14 = arith.constant 1 : i32
    %43 = tpu.dynamic_rotate %42 by %c1_i32_14 dim 1 : vector<64x128xf32>, i32 -> vector<64x128xf32>
    %c97_i32 = arith.constant 97 : i32
    %44 = tpu.dynamic_rotate %42 by %c97_i32 dim 1 : vector<64x128xf32>, i32 -> vector<64x128xf32>
    %c1_i32_15 = arith.constant 1 : i32
    %45 = vector.broadcast %c1_i32_15 : i32 to vector<1x128xi32>
    %46 = arith.cmpi sge, %18, %45 : vector<1x128xi32>
    %47 = vector.shape_cast %46 : vector<1x128xi1> to vector<1x128xi1>
    %48 = vector.broadcast %47 : vector<1x128xi1> to vector<64x128xi1>
    %49 = arith.select %48, %43, %44 : vector<64x128xi1>, vector<64x128xf32>
    %50 = arith.addf %42, %49 : vector<64x128xf32>
    %c2_i32 = arith.constant 2 : i32
    %51 = tpu.dynamic_rotate %50 by %c2_i32 dim 1 : vector<64x128xf32>, i32 -> vector<64x128xf32>
    %c98_i32 = arith.constant 98 : i32
    %52 = tpu.dynamic_rotate %50 by %c98_i32 dim 1 : vector<64x128xf32>, i32 -> vector<64x128xf32>
    %c2_i32_16 = arith.constant 2 : i32
    %53 = vector.broadcast %c2_i32_16 : i32 to vector<1x128xi32>
    %54 = arith.cmpi sge, %18, %53 : vector<1x128xi32>
    %55 = vector.shape_cast %54 : vector<1x128xi1> to vector<1x128xi1>
    %56 = vector.broadcast %55 : vector<1x128xi1> to vector<64x128xi1>
    %57 = arith.select %56, %51, %52 : vector<64x128xi1>, vector<64x128xf32>
    %58 = arith.addf %50, %57 : vector<64x128xf32>
    %c4_i32 = arith.constant 4 : i32
    %59 = tpu.dynamic_rotate %58 by %c4_i32 dim 1 : vector<64x128xf32>, i32 -> vector<64x128xf32>
    %c100_i32 = arith.constant 100 : i32
    %60 = tpu.dynamic_rotate %58 by %c100_i32 dim 1 : vector<64x128xf32>, i32 -> vector<64x128xf32>
    %c4_i32_17 = arith.constant 4 : i32
    %61 = vector.broadcast %c4_i32_17 : i32 to vector<1x128xi32>
    %62 = arith.cmpi sge, %18, %61 : vector<1x128xi32>
    %63 = vector.shape_cast %62 : vector<1x128xi1> to vector<1x128xi1>
    %64 = vector.broadcast %63 : vector<1x128xi1> to vector<64x128xi1>
    %65 = arith.select %64, %59, %60 : vector<64x128xi1>, vector<64x128xf32>
    %66 = arith.addf %58, %65 : vector<64x128xf32>
    %c8_i32 = arith.constant 8 : i32
    %67 = tpu.dynamic_rotate %66 by %c8_i32 dim 1 : vector<64x128xf32>, i32 -> vector<64x128xf32>
    %c104_i32 = arith.constant 104 : i32
    %68 = tpu.dynamic_rotate %66 by %c104_i32 dim 1 : vector<64x128xf32>, i32 -> vector<64x128xf32>
    %c8_i32_18 = arith.constant 8 : i32
    %69 = vector.broadcast %c8_i32_18 : i32 to vector<1x128xi32>
    %70 = arith.cmpi sge, %18, %69 : vector<1x128xi32>
    %71 = vector.shape_cast %70 : vector<1x128xi1> to vector<1x128xi1>
    %72 = vector.broadcast %71 : vector<1x128xi1> to vector<64x128xi1>
    %73 = arith.select %72, %67, %68 : vector<64x128xi1>, vector<64x128xf32>
    %74 = arith.addf %66, %73 : vector<64x128xf32>
    %c16_i32 = arith.constant 16 : i32
    %75 = tpu.dynamic_rotate %74 by %c16_i32 dim 1 : vector<64x128xf32>, i32 -> vector<64x128xf32>
    %c112_i32 = arith.constant 112 : i32
    %76 = tpu.dynamic_rotate %74 by %c112_i32 dim 1 : vector<64x128xf32>, i32 -> vector<64x128xf32>
    %c16_i32_19 = arith.constant 16 : i32
    %77 = vector.broadcast %c16_i32_19 : i32 to vector<1x128xi32>
    %78 = arith.cmpi sge, %18, %77 : vector<1x128xi32>
    %79 = vector.shape_cast %78 : vector<1x128xi1> to vector<1x128xi1>
    %80 = vector.broadcast %79 : vector<1x128xi1> to vector<64x128xi1>
    %81 = arith.select %80, %75, %76 : vector<64x128xi1>, vector<64x128xf32>
    %82 = arith.addf %74, %81 : vector<64x128xf32>
    %83 = vector.extract_strided_slice %82 {offsets = [0, 0], sizes = [32, 128], strides = [1, 1]} : vector<64x128xf32> to vector<32x128xf32>
    %cst_20 = arith.constant 3.125000e-02 : f32
    %84 = vector.broadcast %cst_20 : f32 to vector<32x128xf32>
    %85 = arith.mulf %83, %84 : vector<32x128xf32>
    %86 = vector.extract_strided_slice %82 {offsets = [32, 0], sizes = [32, 128], strides = [1, 1]} : vector<64x128xf32> to vector<32x128xf32>
    %cst_21 = arith.constant 3.125000e-02 : f32
    %87 = vector.broadcast %cst_21 : f32 to vector<32x128xf32>
    %88 = arith.mulf %86, %87 : vector<32x128xf32>
    %89 = arith.mulf %85, %85 : vector<32x128xf32>
    %90 = arith.subf %88, %89 : vector<32x128xf32>
    %cst_22 = arith.constant 9.99999974E-6 : f32
    %91 = vector.broadcast %cst_22 : f32 to vector<32x128xf32>
    %92 = arith.addf %90, %91 : vector<32x128xf32>
    %93 = math.rsqrt %92 : vector<32x128xf32>
    %94 = arith.subf %40, %85 : vector<32x128xf32>
    %95 = arith.mulf %94, %93 : vector<32x128xf32>
    %c0_23 = arith.constant 0 : index
    %c0_24 = arith.constant 0 : index
    %96 = vector.load %arg4[%c0_23, %c0_24] : memref<1x128xf32, #tpu.memory_space<vmem>>, vector<1x128xf32>
    %97 = vector.broadcast %96 : vector<1x128xf32> to vector<32x128xf32>
    %98 = arith.mulf %95, %97 : vector<32x128xf32>
    %c0_25 = arith.constant 0 : index
    %c0_26 = arith.constant 0 : index
    %99 = vector.load %arg5[%c0_25, %c0_26] : memref<1x128xf32, #tpu.memory_space<vmem>>, vector<1x128xf32>
    %100 = vector.broadcast %99 : vector<1x128xf32> to vector<32x128xf32>
    %101 = arith.addf %98, %100 : vector<32x128xf32>
    %c1_i32_27 = arith.constant 1 : i32
    %102 = tpu.dynamic_rotate %101 by %c1_i32_27 dim 1 : vector<32x128xf32>, i32 -> vector<32x128xf32>
    %cst_28 = arith.constant 0.000000e+00 : f32
    %103 = vector.shape_cast %20 : vector<1x128xi1> to vector<1x128xi1>
    %104 = vector.broadcast %103 : vector<1x128xi1> to vector<32x128xi1>
    %105 = vector.broadcast %cst_28 : f32 to vector<32x128xf32>
    %106 = arith.select %104, %102, %105 : vector<32x128xi1>, vector<32x128xf32>
    %c127_i32_29 = arith.constant 127 : i32
    %107 = tpu.dynamic_rotate %101 by %c127_i32_29 dim 1 : vector<32x128xf32>, i32 -> vector<32x128xf32>
    %cst_30 = arith.constant 0.000000e+00 : f32
    %108 = vector.shape_cast %22 : vector<1x128xi1> to vector<1x128xi1>
    %109 = vector.broadcast %108 : vector<1x128xi1> to vector<32x128xi1>
    %110 = vector.broadcast %cst_30 : f32 to vector<32x128xf32>
    %111 = arith.select %109, %107, %110 : vector<32x128xi1>, vector<32x128xf32>
    %112 = tpu.concatenate %106, %101, %111 in 0 : vector<32x128xf32>, vector<32x128xf32>, vector<32x128xf32> -> vector<96x128xf32>
    %c0_31 = arith.constant 0 : index
    %c0_32 = arith.constant 0 : index
    %113 = vector.load %arg6[%c0_31, %c0_32] : memref<32x96xf32, #tpu.memory_space<vmem>>, vector<32x96xf32>
    %cst_33 = arith.constant dense<0.000000e+00> : vector<32x128xf32>
    %114 = tpu.matmul %113, %112, %cst_33 {dimension_numbers = #tpu.dot_dimension_numbers<[1], [0], [0], [1], [0, 0, 1, 1], [], []>} : vector<32x96xf32>, vector<96x128xf32>, vector<32x128xf32> -> vector<32x128xf32>
    %c0_34 = arith.constant 0 : index
    %c0_35 = arith.constant 0 : index
    %115 = vector.load %arg7[%c0_34, %c0_35] : memref<32x1xf32, #tpu.memory_space<vmem>>, vector<32x1xf32>
    %116 = vector.broadcast %115 : vector<32x1xf32> to vector<32x128xf32>
    %117 = arith.addf %114, %116 : vector<32x128xf32>
    %cst_36 = arith.constant 0.000000e+00 : f32
    %118 = vector.broadcast %cst_36 : f32 to vector<32x128xf32>
    %119 = arith.maximumf %117, %118 : vector<32x128xf32>
    %120 = arith.mulf %119, %119 : vector<32x128xf32>
    %121 = tpu.concatenate %119, %120 in 0 : vector<32x128xf32>, vector<32x128xf32> -> vector<64x128xf32>
    %c1_i32_37 = arith.constant 1 : i32
    %122 = tpu.dynamic_rotate %121 by %c1_i32_37 dim 1 : vector<64x128xf32>, i32 -> vector<64x128xf32>
    %c97_i32_38 = arith.constant 97 : i32
    %123 = tpu.dynamic_rotate %121 by %c97_i32_38 dim 1 : vector<64x128xf32>, i32 -> vector<64x128xf32>
    %c1_i32_39 = arith.constant 1 : i32
    %124 = vector.broadcast %c1_i32_39 : i32 to vector<1x128xi32>
    %125 = arith.cmpi sge, %18, %124 : vector<1x128xi32>
    %126 = vector.shape_cast %125 : vector<1x128xi1> to vector<1x128xi1>
    %127 = vector.broadcast %126 : vector<1x128xi1> to vector<64x128xi1>
    %128 = arith.select %127, %122, %123 : vector<64x128xi1>, vector<64x128xf32>
    %129 = arith.addf %121, %128 : vector<64x128xf32>
    %c2_i32_40 = arith.constant 2 : i32
    %130 = tpu.dynamic_rotate %129 by %c2_i32_40 dim 1 : vector<64x128xf32>, i32 -> vector<64x128xf32>
    %c98_i32_41 = arith.constant 98 : i32
    %131 = tpu.dynamic_rotate %129 by %c98_i32_41 dim 1 : vector<64x128xf32>, i32 -> vector<64x128xf32>
    %c2_i32_42 = arith.constant 2 : i32
    %132 = vector.broadcast %c2_i32_42 : i32 to vector<1x128xi32>
    %133 = arith.cmpi sge, %18, %132 : vector<1x128xi32>
    %134 = vector.shape_cast %133 : vector<1x128xi1> to vector<1x128xi1>
    %135 = vector.broadcast %134 : vector<1x128xi1> to vector<64x128xi1>
    %136 = arith.select %135, %130, %131 : vector<64x128xi1>, vector<64x128xf32>
    %137 = arith.addf %129, %136 : vector<64x128xf32>
    %c4_i32_43 = arith.constant 4 : i32
    %138 = tpu.dynamic_rotate %137 by %c4_i32_43 dim 1 : vector<64x128xf32>, i32 -> vector<64x128xf32>
    %c100_i32_44 = arith.constant 100 : i32
    %139 = tpu.dynamic_rotate %137 by %c100_i32_44 dim 1 : vector<64x128xf32>, i32 -> vector<64x128xf32>
    %c4_i32_45 = arith.constant 4 : i32
    %140 = vector.broadcast %c4_i32_45 : i32 to vector<1x128xi32>
    %141 = arith.cmpi sge, %18, %140 : vector<1x128xi32>
    %142 = vector.shape_cast %141 : vector<1x128xi1> to vector<1x128xi1>
    %143 = vector.broadcast %142 : vector<1x128xi1> to vector<64x128xi1>
    %144 = arith.select %143, %138, %139 : vector<64x128xi1>, vector<64x128xf32>
    %145 = arith.addf %137, %144 : vector<64x128xf32>
    %c8_i32_46 = arith.constant 8 : i32
    %146 = tpu.dynamic_rotate %145 by %c8_i32_46 dim 1 : vector<64x128xf32>, i32 -> vector<64x128xf32>
    %c104_i32_47 = arith.constant 104 : i32
    %147 = tpu.dynamic_rotate %145 by %c104_i32_47 dim 1 : vector<64x128xf32>, i32 -> vector<64x128xf32>
    %c8_i32_48 = arith.constant 8 : i32
    %148 = vector.broadcast %c8_i32_48 : i32 to vector<1x128xi32>
    %149 = arith.cmpi sge, %18, %148 : vector<1x128xi32>
    %150 = vector.shape_cast %149 : vector<1x128xi1> to vector<1x128xi1>
    %151 = vector.broadcast %150 : vector<1x128xi1> to vector<64x128xi1>
    %152 = arith.select %151, %146, %147 : vector<64x128xi1>, vector<64x128xf32>
    %153 = arith.addf %145, %152 : vector<64x128xf32>
    %c16_i32_49 = arith.constant 16 : i32
    %154 = tpu.dynamic_rotate %153 by %c16_i32_49 dim 1 : vector<64x128xf32>, i32 -> vector<64x128xf32>
    %c112_i32_50 = arith.constant 112 : i32
    %155 = tpu.dynamic_rotate %153 by %c112_i32_50 dim 1 : vector<64x128xf32>, i32 -> vector<64x128xf32>
    %c16_i32_51 = arith.constant 16 : i32
    %156 = vector.broadcast %c16_i32_51 : i32 to vector<1x128xi32>
    %157 = arith.cmpi sge, %18, %156 : vector<1x128xi32>
    %158 = vector.shape_cast %157 : vector<1x128xi1> to vector<1x128xi1>
    %159 = vector.broadcast %158 : vector<1x128xi1> to vector<64x128xi1>
    %160 = arith.select %159, %154, %155 : vector<64x128xi1>, vector<64x128xf32>
    %161 = arith.addf %153, %160 : vector<64x128xf32>
    %162 = vector.extract_strided_slice %161 {offsets = [0, 0], sizes = [32, 128], strides = [1, 1]} : vector<64x128xf32> to vector<32x128xf32>
    %cst_52 = arith.constant 3.125000e-02 : f32
    %163 = vector.broadcast %cst_52 : f32 to vector<32x128xf32>
    %164 = arith.mulf %162, %163 : vector<32x128xf32>
    %165 = vector.extract_strided_slice %161 {offsets = [32, 0], sizes = [32, 128], strides = [1, 1]} : vector<64x128xf32> to vector<32x128xf32>
    %cst_53 = arith.constant 3.125000e-02 : f32
    %166 = vector.broadcast %cst_53 : f32 to vector<32x128xf32>
    %167 = arith.mulf %165, %166 : vector<32x128xf32>
    %168 = arith.mulf %164, %164 : vector<32x128xf32>
    %169 = arith.subf %167, %168 : vector<32x128xf32>
    %cst_54 = arith.constant 9.99999974E-6 : f32
    %170 = vector.broadcast %cst_54 : f32 to vector<32x128xf32>
    %171 = arith.addf %169, %170 : vector<32x128xf32>
    %172 = math.rsqrt %171 : vector<32x128xf32>
    %173 = arith.subf %119, %164 : vector<32x128xf32>
    %174 = arith.mulf %173, %172 : vector<32x128xf32>
    %c0_55 = arith.constant 0 : index
    %c0_56 = arith.constant 0 : index
    %175 = vector.load %arg8[%c0_55, %c0_56] : memref<1x128xf32, #tpu.memory_space<vmem>>, vector<1x128xf32>
    %176 = vector.broadcast %175 : vector<1x128xf32> to vector<32x128xf32>
    %177 = arith.mulf %174, %176 : vector<32x128xf32>
    %c0_57 = arith.constant 0 : index
    %c0_58 = arith.constant 0 : index
    %178 = vector.load %arg9[%c0_57, %c0_58] : memref<1x128xf32, #tpu.memory_space<vmem>>, vector<1x128xf32>
    %179 = vector.broadcast %178 : vector<1x128xf32> to vector<32x128xf32>
    %180 = arith.addf %177, %179 : vector<32x128xf32>
    %c0_59 = arith.constant 0 : index
    %c0_60 = arith.constant 0 : index
    %181 = vector.load %arg10[%c0_59, %c0_60] : memref<128x4xf32, #tpu.memory_space<vmem>>, vector<128x4xf32>
    %cst_61 = arith.constant dense<0.000000e+00> : vector<32x4xf32>
    %182 = tpu.matmul %180, %181, %cst_61 {dimension_numbers = #tpu.dot_dimension_numbers<[1], [0], [0], [1], [0, 0, 1, 1], [], []>} : vector<32x128xf32>, vector<128x4xf32>, vector<32x4xf32> -> vector<32x4xf32>
    %c0_62 = arith.constant 0 : index
    %c0_63 = arith.constant 0 : index
    %183 = vector.load %arg11[%c0_62, %c0_63] : memref<1x1xf32, #tpu.memory_space<vmem>>, vector<1x1xf32>
    %184 = vector.broadcast %183 : vector<1x1xf32> to vector<32x4xf32>
    %185 = arith.addf %182, %184 : vector<32x4xf32>
    %c0_64 = arith.constant 0 : index
    %c0_65 = arith.constant 0 : index
    %c0_66 = arith.constant 0 : index
    %186 = vector.load %arg12[%c0_64, %c0_65, %c0_66] : memref<1x32x4xf32, #tpu.memory_space<vmem>>, vector<1x32x4xf32>
    %187 = vector.shape_cast %186 : vector<1x32x4xf32> to vector<32x4xf32>
    %188 = vector.shape_cast %185 : vector<32x4xf32> to vector<1x32x4xf32>
    tpu.vector_store %arg12[%c0_64, %c0_65, %c0_66], %188 {strides = array<i32>} : memref<1x32x4xf32, #tpu.memory_space<vmem>>, vector<1x32x4xf32>,
    return
  }
  func.func @transform_0(%arg0: i32) -> (i32, i32, i32) {
    %c0_i32 = arith.constant 0 : i32
    %c0_i32_0 = arith.constant 0 : i32
    %c0_i32_1 = arith.constant 0 : i32
    return %arg0, %c0_i32, %c0_i32_0 : i32, i32, i32
  }
  func.func @transform_1(%arg0: i32) -> (i32, i32) {
    %c0_i32 = arith.constant 0 : i32
    %c0_i32_0 = arith.constant 0 : i32
    %c0_i32_1 = arith.constant 0 : i32
    return %c0_i32, %c0_i32_0 : i32, i32
  }
  func.func @transform_2(%arg0: i32) -> (i32, i32) {
    %c0_i32 = arith.constant 0 : i32
    %c0_i32_0 = arith.constant 0 : i32
    %c0_i32_1 = arith.constant 0 : i32
    return %c0_i32, %c0_i32_0 : i32, i32
  }
  func.func @transform_3(%arg0: i32) -> (i32, i32) {
    %c0_i32 = arith.constant 0 : i32
    %c0_i32_0 = arith.constant 0 : i32
    %c0_i32_1 = arith.constant 0 : i32
    return %c0_i32, %c0_i32_0 : i32, i32
  }
  func.func @transform_4(%arg0: i32) -> (i32, i32) {
    %c0_i32 = arith.constant 0 : i32
    %c0_i32_0 = arith.constant 0 : i32
    %c0_i32_1 = arith.constant 0 : i32
    return %c0_i32, %c0_i32_0 : i32, i32
  }
  func.func @transform_5(%arg0: i32) -> (i32, i32) {
    %c0_i32 = arith.constant 0 : i32
    %c0_i32_0 = arith.constant 0 : i32
    %c0_i32_1 = arith.constant 0 : i32
    return %c0_i32, %c0_i32_0 : i32, i32
  }
  func.func @transform_6(%arg0: i32) -> (i32, i32) {
    %c0_i32 = arith.constant 0 : i32
    %c0_i32_0 = arith.constant 0 : i32
    %c0_i32_1 = arith.constant 0 : i32
    return %c0_i32, %c0_i32_0 : i32, i32
  }
  func.func @transform_7(%arg0: i32) -> (i32, i32) {
    %c0_i32 = arith.constant 0 : i32
    %c0_i32_0 = arith.constant 0 : i32
    %c0_i32_1 = arith.constant 0 : i32
    return %c0_i32, %c0_i32_0 : i32, i32
  }
  func.func @transform_8(%arg0: i32) -> (i32, i32) {
    %c0_i32 = arith.constant 0 : i32
    %c0_i32_0 = arith.constant 0 : i32
    %c0_i32_1 = arith.constant 0 : i32
    return %c0_i32, %c0_i32_0 : i32, i32
  }
  func.func @transform_9(%arg0: i32) -> (i32, i32) {
    %c0_i32 = arith.constant 0 : i32
    %c0_i32_0 = arith.constant 0 : i32
    %c0_i32_1 = arith.constant 0 : i32
    return %c0_i32, %c0_i32_0 : i32, i32
  }
  func.func @transform_10(%arg0: i32) -> (i32, i32) {
    %c0_i32 = arith.constant 0 : i32
    %c0_i32_0 = arith.constant 0 : i32
    %c0_i32_1 = arith.constant 0 : i32
    return %c0_i32, %c0_i32_0 : i32, i32
  }
  func.func @transform_11(%arg0: i32) -> (i32, i32, i32) {
    %c0_i32 = arith.constant 0 : i32
    %c0_i32_0 = arith.constant 0 : i32
    %c0_i32_1 = arith.constant 0 : i32
    return %arg0, %c0_i32, %c0_i32_0 : i32, i32, i32
  }
}

</mosaic_0001>

<bundles_post_ra>
// kernel: tpu_custom_call.1
= control target key start
LH: loop header
LB: loop body
LE: loop exit
PB: predicated region body
PF: predicated region fallthrough
CT: control target
= control target key end

     0   :  { %s1951_s19 = smov 0   ;;  %s2587_s0 = inlined_call_operand.vmem [shape: f32[2,32,128], index: 0, kind: input, shape index: {}]   ;;  %s2588_s1 = inlined_call_operand.vmem [shape: f32[32,96], index: 1, kind: input, shape index: {}]   ;;  %s2589_s2 = inlined_call_operand.vmem [shape: f32[32,1], index: 2, kind: input, shape index: {}]   ;;  %s2590_s3 = inlined_call_operand.vmem [shape: f32[1,128], index: 3, kind: input, shape index: {}]   ;;  %s2591_s4 = inlined_call_operand.vmem [shape: f32[1,128], index: 4, kind: input, shape index: {}]   ;;  %s2592_s5 = inlined_call_operand.vmem [shape: f32[32,96], index: 5, kind: input, shape index: {}]   ;;  %s2593_s6 = inlined_call_operand.vmem [shape: f32[32,1], index: 6, kind: input, shape index: {}]   ;;  %s2594_s7 = inlined_call_operand.vmem [shape: f32[1,128], index: 7, kind: input, shape index: {}]   ;;  %s2595_s8 = inlined_call_operand.vmem [shape: f32[1,128], index: 8, kind: input, shape index: {}]   ;;  %s2596_s9 = inlined_call_operand.vmem [shape: f32[128,4], index: 9, kind: input, shape index: {}]   ;;  %s2597_s10 = inlined_call_operand.<no memory space> [shape: f32[1,1], index: 10, kind: input, shape index: {}]   ;;  %s2598_s11 = inlined_call_operand.vmem [shape: f32[2,32,4], index: 11, kind: output, shape index: {}]  }
   0x1   :  { %v16_v0 = vstv %s2597_s10 }
   0x2   :  { %17 = vst [vmem:[#allocation2] sm:$0x1] %v16_v0 }
   0x3 LB: > { %s1502_s20 = sadd.s32 4294967295, %s1874_s19   ;;  %p1506_p0 = scmp.ge.s32.totalorder %s1874_s19, 1  ;;  %s1874_s19 = sphi %s1951_s19, %s23_s19  }
   0x4   : > { %p339_p1 = scmp.lt.s32.totalorder %s1874_s19, 3 }
   0x6   : > { %p340_p2 = pnand %p1506_p0, %p339_p1 }
   0x7   : > { %p379_p3 = scmp.lt.s32.totalorder (!%p340_p2), %s1502_s20, 1  ;;  %s1876_s24 = smov (!%p340_p2), 1   ;;  %v437_v9 = vld [vmem:[%s2588_s1] sm:$0xff] (!%p340_p2)  ;;  %vm465_vm0 = vcmask (!%p340_p2), 785408   ;;  %v442_v10 = vld [vmem:[%s2589_s2 + $0x8] sm:$0xff] (!%p340_p2)  ;;  %v1878_v12 = vmov (!%p340_p2), 0   ;;  %v393_v15 = vlaneseq (!%p340_p2) }
   0x8   : > { %343 = sbr.rel (%p340_p2) target bundleno = 2253 (0x8cd), region = 64  ;;  %s1877_s25 = smov (!%p340_p2), 127   ;;  %1620 = vmatprep.mubr.msk.f32.mxu1 (!%p340_p2), %vm465_vm0, %v437_v9  ;;  %v441_v11 = vld [vmem:[%s2589_s2] sm:$0xff] (!%p340_p2)  ;;  %1831 = vset.pattern.permute.xlu1 (!%p340_p2), %v1878_v12  ;;  %v443_v13 = vld [vmem:[%s2589_s2 + $0x10] sm:$0xff] (!%p340_p2)  ;;  %v444_v14 = vld [vmem:[%s2589_s2 + $0x18] sm:$0xff] (!%p340_p2)  ;;  %vm1442_vm10 = vcmask (!%p340_p2), 31744  }
   0x9   : > { %1830 = vset.pattern.permute.xlu0 (!%p340_p2), %v1878_v12  ;;  %v394_v16 = vand.u32 (!%p340_p2), 127, %v393_v15  ;;  %v438_v36 = vld [vmem:[%s2588_s1 + $0x8] sm:$0xff] (!%p340_p2)  ;;  %v439_v37 = vld [vmem:[%s2588_s1 + $0x10] sm:$0xff] (!%p340_p2)  ;;  %v440_v38 = vld [vmem:[%s2588_s1 + $0x18] sm:$0xff] (!%p340_p2)  ;;  %s1879_s27 = smov (!%p340_p2), 97   ;;  %s1880_s28 = smov (!%p340_p2), 2  }
   0xa   : > { %s1881_s29 = smov (!%p340_p2), 98   ;;  %s1882_s30 = smov (!%p340_p2), 4   ;;  %v905_v21 = vld [vmem:[%s2592_s5 + $0x8] sm:$0xff] (!%p340_p2) }
   0xb   : > { %v1987_v17 = vand.u32 (!%p340_p2), 31, %v394_v16  ;;  %s1883_s12 = smov (!%p340_p2), 100   ;;  %s1884_s13 = smov (!%p340_p2), 8  }
   0xc   : > { %s1885_s14 = smov (!%p340_p2), 104   ;;  %s1886_s15 = smov (!%p340_p2), 16  }
   0xd   : > { %vm407_vm1 = vcmp.ne.s32.totalorder (!%p340_p2), %v1987_v17, 0  ;;  %vm408_vm3 = vcmp.ne.s32.totalorder (!%p340_p2), %v1987_v17, 31  ;;  %vm603_vm5 = vcmp.ge.s32.totalorder (!%p340_p2), %v1987_v17, 1  ;;  %vm654_vm6 = vcmp.ge.s32.totalorder (!%p340_p2), %v1987_v17, 2  ;;  %s1887_s16 = smov (!%p340_p2), 112  }
   0xe   : > { %vm1990_vm2 = vmpackc.low (!%p340_p2), %vm407_vm1, %vm407_vm1  ;;  %vm705_vm7 = vcmp.ge.s32.totalorder (!%p340_p2), %v1987_v17, 4  ;;  %vm756_vm8 = vcmp.ge.s32.totalorder (!%p340_p2), %v1987_v17, 8  ;;  %vm807_vm9 = vcmp.ge.s32.totalorder (!%p340_p2), %v1987_v17, 16  ;;  %v1538_v17 = vld [vmem:[%s2595_s8] ss:$0 sm:$0xff] (!%p340_p2) }
   0xf   : > { %s2604_s20 = smov (!%p379_p3, %s1502_s20), 1  ;;  %vm2003_vm4 = vmpackc.low %vm408_vm3, %vm408_vm3 }
  0x10   : > { %s1542_s10 = sshll.u32 %s2604_s20, 5 }
  0x11   : > { %s383_s23 = scalar_lea.vmem %s2587_s0, %s1542_s10  ;;  %s388_s18 = scalar_lea.vmem %s2598_s11, %s1542_s10 }
  0x12   : > { %v389_v1 = vld [vmem:[%s383_s23] sm:$0xff]  ;;  %v390_v2 = vld [vmem:[%s383_s23 + $0x8] sm:$0xff]  ;;  %v391_v3 = vld [vmem:[%s383_s23 + $0x10] sm:$0xff] }
  0x13   : > { %v1810_v4 = vpack.i.bf16 %v390_v2, %v389_v1  ;;  %v392_v5 = vld [vmem:[%s383_s23 + $0x18] sm:$0xff]  ;;  %v1706_v6 = vpack.c.bf16 %v390_v2, %v389_v1 }
  0x14   : > { %v1815_v7 = vpack.i.bf16 %v392_v5, %v391_v3  ;;  %v1710_v8 = vpack.c.bf16 %v392_v5, %v391_v3 }
  0x15   : > { %1811 = vrot.lane.b32.xlu0 %v1810_v4, %s1876_s24  ;;  %1821 = vrot.lane.b32.xlu1 %v1810_v4, %s1877_s25 }
  0x19   : > { %1816 = vrot.lane.b32.xlu0 %v1815_v7, %s1876_s24  ;;  %1826 = vrot.lane.b32.xlu1 %v1815_v7, %s1877_s25 }
  0x1d   : > { %452 = vperm.xlu1 %1831, %v442_v10   ;;  %447 = vperm.xlu0 %1830, %v441_v11  }
  0x21   : > { %457 = vperm.xlu1 %1831, %v443_v13   ;;  %462 = vperm.xlu0 %1830, %v444_v14  }
  0x87   : > { %v1812_v18 = vpop.permute.xlu0 %1811  ;;  %v1822_v26 = vpop.permute.xlu1 %1821 }
  0x88   : > { %v1814_v19 = vunpack.i.h.bf16 %v1812_v18  ;;  %v1813_v20 = vunpack.i.l.bf16 %v1812_v18  ;;  %v1824_v28 = vunpack.i.h.bf16 %v1822_v26  ;;  %v1823_v29 = vunpack.i.l.bf16 %v1822_v26 }
  0x8a   : > { %v1694_v22 = vpack.c.bf16 %v1814_v19, %v1813_v20  ;;  %v1714_v31 = vpack.c.bf16 %v1824_v28, %v1823_v29 }
  0x8b   : > { %v1817_v23 = vpop.permute.xlu0 %1816  ;;  %v1827_v30 = vpop.permute.xlu1 %1826 }
  0x8c   : > { %v1819_v24 = vunpack.i.h.bf16 %v1817_v23  ;;  %v1818_v25 = vunpack.i.l.bf16 %v1817_v23  ;;  %1696 = vmatprep.subr.msk.bf16.mxu1 %vm1990_vm2, %v1694_v22  ;;  %v1829_v32 = vunpack.i.h.bf16 %v1827_v30  ;;  %v1828_v33 = vunpack.i.l.bf16 %v1827_v30 }
  0x8d   : > { %1699 = vmatpush3.bf16.msk.msra.mxu1 %vm1990_vm2, %v1694_v22 }
  0x8e   : > { %v1700_v27 = vpack.c.bf16 %v1819_v24, %v1818_v25  ;;  %v1720_v35 = vpack.c.bf16 %v1829_v32, %v1828_v33 }
  0x90   : > { %1702 = vmatprep.subr.msk.bf16.mxu1 %vm1990_vm2, %v1700_v27 }
  0x91   : > { %1705 = vmatpush3.bf16.msk.msra.mxu1 %vm1990_vm2, %v1700_v27 }
  0x92   : > { %1707 = vmatprep.subr.bf16.mxu1 %v1706_v6 }
  0x95   : > { %1709 = vmatpush3.bf16.msra.mxu1 %v1706_v6 }
  0x96   : > { %1711 = vmatprep.subr.bf16.mxu1 %v1710_v8 }
  0x99   : > { %1713 = vmatpush3.bf16.msra.mxu1 %v1710_v8 }
  0x9a   : > { %1716 = vmatprep.subr.msk.bf16.mxu1 %vm2003_vm4, %v1714_v31 }
  0x9c   : > { %v453_v39 = vpop.permute.xlu1 %452  ;;  %v448_v41 = vpop.permute.xlu0 %447 }
  0x9d   : > { %1719 = vmatpush3.bf16.msk.msra.mxu1 %vm2003_vm4, %v1714_v31 }
  0x9e   : > { %1722 = vmatprep.subr.msk.bf16.mxu1 %vm2003_vm4, %v1720_v35 }
  0xa0   : > { %v463_v51 = vpop.permute.xlu0 %462  ;;  %v458_v52 = vpop.permute.xlu1 %457 }
  0xa1   : > { %1725 = vmatpush3.bf16.msk.msra.mxu1 %vm2003_vm4, %v1720_v35 }
  0xa4   : > { %1621 = vmatmul.mubr.msk.f32.vlgmr.msra.gmra.mrb[0].mxu1 %vm465_vm0, %v438_v36 }
  0xa5   : > { %1623 = vmatprep.mubr.msk.f32.mxu1 %vm465_vm0, %v439_v37 }
  0xa8   : > { %1624 = vmatmul.mubr.msk.f32.gmra.mrb[2].mxu1 %vm465_vm0, %v440_v38 }
 0x177   : > { %v1622_v40 = vpop.f32.mrb[0].mxu1 }
 0x178   : > { %v550_v42 = vadd.f32 %v1622_v40, %v453_v39  ;;  %v544_v43 = vpop.f32.mrb[1].mxu1 }
 0x179   : > { %v545_v44 = vadd.f32 %v544_v43, %v448_v41 }
 0x17a   : > { %v2027_v45 = vmax.f32 %v550_v42, 0.0 }
 0x17b   : > { %v2029_v46 = vmax.f32 %v545_v44, 0.0  ;;  %v1625_v47 = vpop.f32.mrb[2].mxu1 }
 0x17c   : > { %573 = vrot.lane.b32.xlu0 %v2027_v45, %s1876_s24  ;;  %v554_v48 = vpop.f32.mrb[3].mxu1  ;;  %v568_v49 = vmul.f32 %v2027_v45, %v2027_v45  ;;  %v560_v53 = vadd.f32 %v1625_v47, %v463_v51 }
 0x17d   : > { %571 = vrot.lane.b32.xlu1 %v2029_v46, %s1876_s24  ;;  %v567_v50 = vmul.f32 %v2029_v46, %v2029_v46  ;;  %v555_v54 = vadd.f32 %v554_v48, %v458_v52 }
 0x17e   : > { %v2047_v55 = vmax.f32 %v560_v53, 0.0 }
 0x17f   : > { %v2049_v56 = vmax.f32 %v555_v54, 0.0 }
 0x180   : > { %589 = vrot.lane.b32.xlu0 %v2027_v45, %s1879_s27  ;;  %v570_v57 = vmul.f32 %v2047_v55, %v2047_v55 }
 0x181   : > { %587 = vrot.lane.b32.xlu1 %v2029_v46, %s1879_s27  ;;  %v569_v58 = vmul.f32 %v2049_v56, %v2049_v56 }
 0x184   : > { %581 = vrot.lane.b32.xlu0 %v568_v49, %s1876_s24 }
 0x185   : > { %579 = vrot.lane.b32.xlu1 %v567_v50, %s1876_s24 }
 0x188   : > { %597 = vrot.lane.b32.xlu0 %v568_v49, %s1879_s27 }
 0x189   : > { %595 = vrot.lane.b32.xlu1 %v567_v50, %s1879_s27 }
 0x18c   : > { %577 = vrot.lane.b32.xlu0 %v2047_v55, %s1876_s24 }
 0x18d   : > { %575 = vrot.lane.b32.xlu1 %v2049_v56, %s1876_s24 }
 0x190   : > { %593 = vrot.lane.b32.xlu0 %v2047_v55, %s1879_s27 }
 0x191   : > { %591 = vrot.lane.b32.xlu1 %v2049_v56, %s1879_s27 }
 0x194   : > { %585 = vrot.lane.b32.xlu0 %v570_v57, %s1876_s24 }
 0x195   : > { %583 = vrot.lane.b32.xlu1 %v569_v58, %s1876_s24 }
 0x198   : > { %601 = vrot.lane.b32.xlu0 %v570_v57, %s1879_s27 }
 0x199   : > { %599 = vrot.lane.b32.xlu1 %v569_v58, %s1879_s27 }
 0x1ee   : > { %v574_v59 = vpop.permute.xlu0 %573 }
 0x1ef   : > { %v572_v60 = vpop.permute.xlu1 %571 }
 0x1f2   : > { %v590_v61 = vpop.permute.xlu0 %589 }
 0x1f3   : > { %v607_v62 = vsel %vm603_vm5, %v574_v59, %v590_v61  ;;  %v588_v63 = vpop.permute.xlu1 %587 }
 0x1f4   : > { %v615_v0 = vadd.f32 %v607_v62, %v2027_v45  ;;  %v606_v1 = vsel %vm603_vm5, %v572_v60, %v588_v63 }
 0x1f5   : > { %v614_v2 = vadd.f32 %v606_v1, %v2029_v46 }
 0x1f6   : > { %v582_v3 = vpop.permute.xlu0 %581  ;;  %624 = vrot.lane.b32.xlu0 %v615_v0, %s1880_s28 }
 0x1f7   : > { %622 = vrot.lane.b32.xlu1 %v614_v2, %s1880_s28  ;;  %v580_v4 = vpop.permute.xlu1 %579 }
 0x1fa   : > { %v598_v5 = vpop.permute.xlu0 %597  ;;  %640 = vrot.lane.b32.xlu0 %v615_v0, %s1881_s29 }
 0x1fb   : > { %v611_v6 = vsel %vm603_vm5, %v582_v3, %v598_v5  ;;  %638 = vrot.lane.b32.xlu1 %v614_v2, %s1881_s29  ;;  %v596_v7 = vpop.permute.xlu1 %595 }
 0x1fc   : > { %v619_v8 = vadd.f32 %v611_v6, %v568_v49  ;;  %v610_v9 = vsel %vm603_vm5, %v580_v4, %v596_v7 }
 0x1fd   : > { %v618_v10 = vadd.f32 %v610_v9, %v567_v50 }
 0x1fe   : > { %v578_v11 = vpop.permute.xlu0 %577  ;;  %632 = vrot.lane.b32.xlu0 %v619_v8, %s1880_s28 }
 0x1ff   : > { %630 = vrot.lane.b32.xlu1 %v618_v10, %s1880_s28  ;;  %v576_v12 = vpop.permute.xlu1 %575 }
 0x202   : > { %v594_v13 = vpop.permute.xlu0 %593  ;;  %648 = vrot.lane.b32.xlu0 %v619_v8, %s1881_s29 }
 0x203   : > { %v609_v14 = vsel %vm603_vm5, %v578_v11, %v594_v13  ;;  %646 = vrot.lane.b32.xlu1 %v618_v10, %s1881_s29  ;;  %v592_v15 = vpop.permute.xlu1 %591 }
 0x204   : > { %v617_v16 = vadd.f32 %v609_v14, %v2047_v55  ;;  %v608_v18 = vsel %vm603_vm5, %v576_v12, %v592_v15 }
 0x205   : > { %v616_v19 = vadd.f32 %v608_v18, %v2049_v56 }
 0x206   : > { %628 = vrot.lane.b32.xlu0 %v617_v16, %s1880_s28  ;;  %v586_v20 = vpop.permute.xlu0 %585 }
 0x207   : > { %626 = vrot.lane.b32.xlu1 %v616_v19, %s1880_s28  ;;  %v584_v22 = vpop.permute.xlu1 %583 }
 0x20a   : > { %644 = vrot.lane.b32.xlu0 %v617_v16, %s1881_s29  ;;  %v602_v23 = vpop.permute.xlu0 %601 }
 0x20b   : > { %v613_v24 = vsel %vm603_vm5, %v586_v20, %v602_v23  ;;  %642 = vrot.lane.b32.xlu1 %v616_v19, %s1881_s29  ;;  %v600_v25 = vpop.permute.xlu1 %599 }
 0x20c   : > { %v621_v26 = vadd.f32 %v613_v24, %v570_v57  ;;  %v612_v27 = vsel %vm603_vm5, %v584_v22, %v600_v25 }
 0x20d   : > { %v620_v28 = vadd.f32 %v612_v27, %v569_v58 }
 0x20e   : > { %636 = vrot.lane.b32.xlu0 %v621_v26, %s1880_s28 }
 0x20f   : > { %634 = vrot.lane.b32.xlu1 %v620_v28, %s1880_s28 }
 0x212   : > { %652 = vrot.lane.b32.xlu0 %v621_v26, %s1881_s29 }
 0x213   : > { %650 = vrot.lane.b32.xlu1 %v620_v28, %s1881_s29 }
 0x268   : > { %v625_v29 = vpop.permute.xlu0 %624 }
 0x269   : > { %v623_v30 = vpop.permute.xlu1 %622 }
 0x26c   : > { %v641_v31 = vpop.permute.xlu0 %640 }
 0x26d   : > { %v658_v32 = vsel %vm654_vm6, %v625_v29, %v641_v31  ;;  %v639_v33 = vpop.permute.xlu1 %638 }
 0x26e   : > { %v666_v35 = vadd.f32 %v658_v32, %v615_v0  ;;  %v657_v36 = vsel %vm654_vm6, %v623_v30, %v639_v33 }
 0x26f   : > { %v665_v37 = vadd.f32 %v657_v36, %v614_v2 }
 0x270   : > { %675 = vrot.lane.b32.xlu0 %v666_v35, %s1882_s30  ;;  %v633_v38 = vpop.permute.xlu0 %632 }
 0x271   : > { %673 = vrot.lane.b32.xlu1 %v665_v37, %s1882_s30  ;;  %v631_v39 = vpop.permute.xlu1 %630 }
 0x274   : > { %691 = vrot.lane.b32.xlu0 %v666_v35, %s1883_s12  ;;  %v649_v40 = vpop.permute.xlu0 %648 }
 0x275   : > { %v662_v41 = vsel %vm654_vm6, %v633_v38, %v649_v40  ;;  %689 = vrot.lane.b32.xlu1 %v665_v37, %s1883_s12  ;;  %v647_v42 = vpop.permute.xlu1 %646 }
 0x276   : > { %v670_v43 = vadd.f32 %v662_v41, %v619_v8  ;;  %v661_v44 = vsel %vm654_vm6, %v631_v39, %v647_v42 }
 0x277   : > { %v669_v47 = vadd.f32 %v661_v44, %v618_v10 }
 0x278   : > { %683 = vrot.lane.b32.xlu0 %v670_v43, %s1882_s30  ;;  %v629_v48 = vpop.permute.xlu0 %628 }
 0x279   : > { %681 = vrot.lane.b32.xlu1 %v669_v47, %s1882_s30  ;;  %v627_v49 = vpop.permute.xlu1 %626 }
 0x27c   : > { %699 = vrot.lane.b32.xlu0 %v670_v43, %s1883_s12  ;;  %v645_v50 = vpop.permute.xlu0 %644 }
 0x27d   : > { %v660_v51 = vsel %vm654_vm6, %v629_v48, %v645_v50  ;;  %697 = vrot.lane.b32.xlu1 %v669_v47, %s1883_s12  ;;  %v643_v52 = vpop.permute.xlu1 %642 }
 0x27e   : > { %v668_v53 = vadd.f32 %v660_v51, %v617_v16  ;;  %v659_v54 = vsel %vm654_vm6, %v627_v49, %v643_v52 }
 0x27f   : > { %v667_v57 = vadd.f32 %v659_v54, %v616_v19 }
 0x280   : > { %679 = vrot.lane.b32.xlu0 %v668_v53, %s1882_s30  ;;  %v637_v58 = vpop.permute.xlu0 %636 }
 0x281   : > { %677 = vrot.lane.b32.xlu1 %v667_v57, %s1882_s30  ;;  %v635_v59 = vpop.permute.xlu1 %634 }
 0x284   : > { %695 = vrot.lane.b32.xlu0 %v668_v53, %s1883_s12  ;;  %v653_v60 = vpop.permute.xlu0 %652 }
 0x285   : > { %v664_v61 = vsel %vm654_vm6, %v637_v58, %v653_v60  ;;  %693 = vrot.lane.b32.xlu1 %v667_v57, %s1883_s12  ;;  %v651_v62 = vpop.permute.xlu1 %650 }
 0x286   : > { %v672_v63 = vadd.f32 %v664_v61, %v621_v26  ;;  %v663_v0 = vsel %vm654_vm6, %v635_v59, %v651_v62 }
 0x287   : > { %v671_v1 = vadd.f32 %v663_v0, %v620_v28 }
 0x288   : > { %687 = vrot.lane.b32.xlu0 %v672_v63, %s1882_s30 }
 0x289   : > { %685 = vrot.lane.b32.xlu1 %v671_v1, %s1882_s30 }
 0x28c   : > { %703 = vrot.lane.b32.xlu0 %v672_v63, %s1883_s12 }
 0x28d   : > { %701 = vrot.lane.b32.xlu1 %v671_v1, %s1883_s12 }
 0x2e2   : > { %v676_v2 = vpop.permute.xlu0 %675 }
 0x2e3   : > { %v674_v3 = vpop.permute.xlu1 %673 }
 0x2e6   : > { %v692_v4 = vpop.permute.xlu0 %691 }
 0x2e7   : > { %v709_v5 = vsel %vm705_vm7, %v676_v2, %v692_v4  ;;  %v690_v6 = vpop.permute.xlu1 %689 }
 0x2e8   : > { %v717_v7 = vadd.f32 %v709_v5, %v666_v35  ;;  %v708_v8 = vsel %vm705_vm7, %v674_v3, %v690_v6 }
 0x2e9   : > { %v716_v9 = vadd.f32 %v708_v8, %v665_v37 }
 0x2ea   : > { %726 = vrot.lane.b32.xlu0 %v717_v7, %s1884_s13  ;;  %v684_v10 = vpop.permute.xlu0 %683 }
 0x2eb   : > { %724 = vrot.lane.b32.xlu1 %v716_v9, %s1884_s13  ;;  %v682_v11 = vpop.permute.xlu1 %681 }
 0x2ee   : > { %742 = vrot.lane.b32.xlu0 %v717_v7, %s1885_s14  ;;  %v700_v12 = vpop.permute.xlu0 %699 }
 0x2ef   : > { %v713_v13 = vsel %vm705_vm7, %v684_v10, %v700_v12  ;;  %740 = vrot.lane.b32.xlu1 %v716_v9, %s1885_s14  ;;  %v698_v14 = vpop.permute.xlu1 %697 }
 0x2f0   : > { %v721_v15 = vadd.f32 %v713_v13, %v670_v43  ;;  %v712_v16 = vsel %vm705_vm7, %v682_v11, %v698_v14 }
 0x2f1   : > { %v720_v18 = vadd.f32 %v712_v16, %v669_v47 }
 0x2f2   : > { %734 = vrot.lane.b32.xlu0 %v721_v15, %s1884_s13  ;;  %v680_v19 = vpop.permute.xlu0 %679 }
 0x2f3   : > { %732 = vrot.lane.b32.xlu1 %v720_v18, %s1884_s13  ;;  %v678_v20 = vpop.permute.xlu1 %677 }
 0x2f6   : > { %750 = vrot.lane.b32.xlu0 %v721_v15, %s1885_s14  ;;  %v696_v22 = vpop.permute.xlu0 %695 }
 0x2f7   : > { %v711_v23 = vsel %vm705_vm7, %v680_v19, %v696_v22  ;;  %748 = vrot.lane.b32.xlu1 %v720_v18, %s1885_s14  ;;  %v694_v24 = vpop.permute.xlu1 %693 }
 0x2f8   : > { %v719_v25 = vadd.f32 %v711_v23, %v668_v53  ;;  %v710_v26 = vsel %vm705_vm7, %v678_v20, %v694_v24 }
 0x2f9   : > { %v718_v27 = vadd.f32 %v710_v26, %v667_v57 }
 0x2fa   : > { %730 = vrot.lane.b32.xlu0 %v719_v25, %s1884_s13  ;;  %v688_v28 = vpop.permute.xlu0 %687 }
 0x2fb   : > { %728 = vrot.lane.b32.xlu1 %v718_v27, %s1884_s13  ;;  %v686_v29 = vpop.permute.xlu1 %685 }
 0x2fe   : > { %746 = vrot.lane.b32.xlu0 %v719_v25, %s1885_s14  ;;  %v704_v30 = vpop.permute.xlu0 %703 }
 0x2ff   : > { %v715_v31 = vsel %vm705_vm7, %v688_v28, %v704_v30  ;;  %744 = vrot.lane.b32.xlu1 %v718_v27, %s1885_s14  ;;  %v702_v32 = vpop.permute.xlu1 %701 }
 0x300   : > { %v723_v33 = vadd.f32 %v715_v31, %v672_v63  ;;  %v714_v35 = vsel %vm705_vm7, %v686_v29, %v702_v32 }
 0x301   : > { %v722_v36 = vadd.f32 %v714_v35, %v671_v1 }
 0x302   : > { %738 = vrot.lane.b32.xlu0 %v723_v33, %s1884_s13 }
 0x303   : > { %736 = vrot.lane.b32.xlu1 %v722_v36, %s1884_s13 }
 0x306   : > { %754 = vrot.lane.b32.xlu0 %v723_v33, %s1885_s14 }
 0x307   : > { %752 = vrot.lane.b32.xlu1 %v722_v36, %s1885_s14 }
 0x35c   : > { %v727_v37 = vpop.permute.xlu0 %726 }
 0x35d   : > { %v725_v38 = vpop.permute.xlu1 %724 }
 0x360   : > { %v743_v39 = vpop.permute.xlu0 %742 }
 0x361   : > { %v760_v40 = vsel %vm756_vm8, %v727_v37, %v743_v39  ;;  %v741_v41 = vpop.permute.xlu1 %740 }
 0x362   : > { %v768_v42 = vadd.f32 %v760_v40, %v717_v7  ;;  %v759_v43 = vsel %vm756_vm8, %v725_v38, %v741_v41 }
 0x363   : > { %v767_v44 = vadd.f32 %v759_v43, %v716_v9 }
 0x364   : > { %777 = vrot.lane.b32.xlu0 %v768_v42, %s1886_s15  ;;  %v735_v47 = vpop.permute.xlu0 %734 }
 0x365   : > { %775 = vrot.lane.b32.xlu1 %v767_v44, %s1886_s15  ;;  %v733_v48 = vpop.permute.xlu1 %732 }
 0x368   : > { %793 = vrot.lane.b32.xlu0 %v768_v42, %s1887_s16  ;;  %v751_v49 = vpop.permute.xlu0 %750 }
 0x369   : > { %v764_v50 = vsel %vm756_vm8, %v735_v47, %v751_v49  ;;  %791 = vrot.lane.b32.xlu1 %v767_v44, %s1887_s16  ;;  %v749_v51 = vpop.permute.xlu1 %748 }
 0x36a   : > { %v772_v52 = vadd.f32 %v764_v50, %v721_v15  ;;  %v763_v53 = vsel %vm756_vm8, %v733_v48, %v749_v51 }
 0x36b   : > { %v771_v54 = vadd.f32 %v763_v53, %v720_v18 }
 0x36c   : > { %785 = vrot.lane.b32.xlu0 %v772_v52, %s1886_s15  ;;  %v731_v57 = vpop.permute.xlu0 %730 }
 0x36d   : > { %783 = vrot.lane.b32.xlu1 %v771_v54, %s1886_s15  ;;  %v729_v58 = vpop.permute.xlu1 %728 }
 0x370   : > { %801 = vrot.lane.b32.xlu0 %v772_v52, %s1887_s16  ;;  %v747_v59 = vpop.permute.xlu0 %746 }
 0x371   : > { %v762_v60 = vsel %vm756_vm8, %v731_v57, %v747_v59  ;;  %799 = vrot.lane.b32.xlu1 %v771_v54, %s1887_s16  ;;  %v745_v61 = vpop.permute.xlu1 %744 }
 0x372   : > { %v770_v62 = vadd.f32 %v762_v60, %v719_v25  ;;  %v761_v63 = vsel %vm756_vm8, %v729_v58, %v745_v61 }
 0x373   : > { %v769_v0 = vadd.f32 %v761_v63, %v718_v27 }
 0x374   : > { %781 = vrot.lane.b32.xlu0 %v770_v62, %s1886_s15  ;;  %v739_v1 = vpop.permute.xlu0 %738 }
 0x375   : > { %779 = vrot.lane.b32.xlu1 %v769_v0, %s1886_s15  ;;  %v737_v2 = vpop.permute.xlu1 %736 }
 0x378   : > { %797 = vrot.lane.b32.xlu0 %v770_v62, %s1887_s16  ;;  %v755_v3 = vpop.permute.xlu0 %754 }
 0x379   : > { %v766_v4 = vsel %vm756_vm8, %v739_v1, %v755_v3  ;;  %795 = vrot.lane.b32.xlu1 %v769_v0, %s1887_s16  ;;  %v753_v5 = vpop.permute.xlu1 %752  ;;  %v1523_v1 = vld [vmem:[%s2590_s3] ss:$0 sm:$0xff] }
 0x37a   : > { %v774_v6 = vadd.f32 %v766_v4, %v723_v33  ;;  %v765_v7 = vsel %vm756_vm8, %v737_v2, %v753_v5 }
 0x37b   : > { %v773_v8 = vadd.f32 %v765_v7, %v722_v36 }
 0x37c   : > { %789 = vrot.lane.b32.xlu0 %v774_v6, %s1886_s15 }
 0x37d   : > { %787 = vrot.lane.b32.xlu1 %v773_v8, %s1886_s15 }
 0x380   : > { %805 = vrot.lane.b32.xlu0 %v774_v6, %s1887_s16 }
 0x381   : > { %803 = vrot.lane.b32.xlu1 %v773_v8, %s1887_s16 }
 0x3d6   : > { %v778_v9 = vpop.permute.xlu0 %777 }
 0x3d7   : > { %v776_v10 = vpop.permute.xlu1 %775 }
 0x3da   : > { %v794_v11 = vpop.permute.xlu0 %793 }
 0x3db   : > { %v811_v12 = vsel %vm807_vm9, %v778_v9, %v794_v11  ;;  %v792_v13 = vpop.permute.xlu1 %791 }
 0x3dc   : > { %v810_v14 = vsel %vm807_vm9, %v776_v10, %v792_v13  ;;  %v819_v15 = vadd.f32 %v811_v12, %v768_v42 }
 0x3dd   : > { %v818_v18 = vadd.f32 %v810_v14, %v767_v44 }
 0x3de   : > { %v786_v16 = vpop.permute.xlu0 %785  ;;  %v827_v20 = vmul.f32 0.03125, %v819_v15 }
 0x3df   : > { %v784_v19 = vpop.permute.xlu1 %783  ;;  %v826_v23 = vmul.f32 0.03125, %v818_v18  ;;  %v908_v18 = vld [vmem:[%s2593_s6] sm:$0xff] }
 0x3e0   : > { %v835_v29 = vmul.f32 %v827_v20, %v827_v20  ;;  %v851_v59 = vsub.f32 %v2027_v45, %v827_v20  ;;  %v1524_v45 = vld [vmem:[%s2591_s4] ss:$0 sm:$0xff] }
 0x3e1   : > { %v834_v32 = vmul.f32 %v826_v23, %v826_v23 }
 0x3e2   : > { %v802_v22 = vpop.permute.xlu0 %801 }
 0x3e3   : > { %v815_v24 = vsel %vm807_vm9, %v786_v16, %v802_v22  ;;  %v800_v25 = vpop.permute.xlu1 %799 }
 0x3e4   : > { %v823_v26 = vadd.f32 %v815_v24, %v772_v52  ;;  %v814_v27 = vsel %vm807_vm9, %v784_v19, %v800_v25  ;;  %v910_v25 = vld [vmem:[%s2593_s6 + $0x10] sm:$0xff] }
 0x3e5   : > { %v822_v28 = vadd.f32 %v814_v27, %v771_v54 }
 0x3e6   : > { %v831_v30 = vmul.f32 0.03125, %v823_v26  ;;  %v782_v31 = vpop.permute.xlu0 %781 }
 0x3e7   : > { %v830_v33 = vmul.f32 0.03125, %v822_v28  ;;  %v780_v35 = vpop.permute.xlu1 %779 }
 0x3e8   : > { %v839_v36 = vsub.f32 %v831_v30, %v835_v29 }
 0x3e9   : > { %v838_v37 = vsub.f32 %v830_v33, %v834_v32  ;;  %v911_v32 = vld [vmem:[%s2593_s6 + $0x18] sm:$0xff] }
 0x3ea   : > { %v843_v38 = vadd.f32 1e-05, %v839_v36  ;;  %v798_v39 = vpop.permute.xlu0 %797 }
 0x3eb   : > { %v842_v40 = vadd.f32 1e-05, %v838_v37  ;;  %v813_v41 = vsel %vm807_vm9, %v782_v31, %v798_v39  ;;  %v796_v42 = vpop.permute.xlu1 %795  ;;  %v904_v31 = vld [vmem:[%s2592_s5] sm:$0xff] }
 0x3ec   : > { %1852 = vrsqrt.f32 %v843_v38  ;;  %v812_v43 = vsel %vm807_vm9, %v780_v35, %v796_v42  ;;  %v821_v44 = vadd.f32 %v813_v41, %v770_v62  ;;  %v850_v62 = vsub.f32 %v2029_v46, %v826_v23  ;;  %1650 = vmatprep.mubr.msk.f32.mxu1 %vm465_vm0, %v904_v31 }
 0x3ed   : > { %1854 = vrsqrt.f32 %v842_v40  ;;  %v820_v48 = vadd.f32 %v812_v43, %v769_v0 }
 0x3ee   : > { %v790_v47 = vpop.permute.xlu0 %789  ;;  %v829_v50 = vmul.f32 0.03125, %v821_v44 }
 0x3ef   : > { %v788_v49 = vpop.permute.xlu1 %787  ;;  %v828_v52 = vmul.f32 0.03125, %v820_v48 }
 0x3f0   : > { %v837_v63 = vmul.f32 %v829_v50, %v829_v50  ;;  %v853_v16 = vsub.f32 %v2047_v55, %v829_v50 }
 0x3f1   : > { %v836_v3 = vmul.f32 %v828_v52, %v828_v52  ;;  %v852_v20 = vsub.f32 %v2049_v56, %v828_v52  ;;  %v909_v56 = vld [vmem:[%s2593_s6 + $0x8] sm:$0xff]  ;;  %v906_v52 = vld [vmem:[%s2592_s5 + $0x10] sm:$0xff] }
 0x3f2   : > { %v806_v51 = vpop.permute.xlu0 %805 }
 0x3f3   : > { %v817_v53 = vsel %vm807_vm9, %v790_v47, %v806_v51  ;;  %v804_v54 = vpop.permute.xlu1 %803 }
 0x3f4   : > { %v825_v57 = vadd.f32 %v817_v53, %v774_v6  ;;  %v816_v58 = vsel %vm807_vm9, %v788_v49, %v804_v54  ;;  %v907_v53 = vld [vmem:[%s2592_s5 + $0x18] sm:$0xff] }
 0x3f5   : > { %v824_v60 = vadd.f32 %v816_v58, %v773_v8 }
 0x3f6   : > { %v1853_v61 = vpop.eup %1852  ;;  %v833_v0 = vmul.f32 0.03125, %v825_v57 }
 0x3f7   : > { %v1855_v2 = vpop.eup %1854  ;;  %v832_v4 = vmul.f32 0.03125, %v824_v60  ;;  %v855_v5 = vmul.f32 %v1853_v61, %v851_v59 }
 0x3f8   : > { %v841_v6 = vsub.f32 %v833_v0, %v837_v63  ;;  %v854_v7 = vmul.f32 %v1855_v2, %v850_v62 }
 0x3f9   : > { %v840_v8 = vsub.f32 %v832_v4, %v836_v3  ;;  %v866_v9 = vmul.f32 %v1523_v1, %v855_v5 }
 0x3fa   : > { %v845_v10 = vadd.f32 1e-05, %v841_v6  ;;  %v865_v46 = vmul.f32 %v1523_v1, %v854_v7 }
 0x3fb   : > { %v844_v11 = vadd.f32 1e-05, %v840_v8  ;;  %v877_v12 = vadd.f32 %v1524_v45, %v866_v9 }
 0x3fc   : > { %1856 = vrsqrt.f32 %v845_v10  ;;  %v876_v13 = vadd.f32 %v1524_v45, %v865_v46 }
 0x3fd   : > { %1858 = vrsqrt.f32 %v844_v11 }
 0x3fe   : > { %v1832_v14 = vpack.i.bf16 %v877_v12, %v876_v13  ;;  %v1738_v15 = vpack.c.bf16 %v877_v12, %v876_v13 }
 0x400   : > { %1833 = vrot.lane.b32.xlu1 %v1832_v14, %s1876_s24 }
 0x404   : > { %1843 = vrot.lane.b32.xlu1 %v1832_v14, %s1877_s25 }
 0x406   : > { %v1857_v19 = vpop.eup %1856 }
 0x407   : > { %v1859_v22 = vpop.eup %1858  ;;  %v857_v23 = vmul.f32 %v1857_v19, %v853_v16 }
 0x408   : > { %914 = vperm.xlu1 %1831, %v908_v18   ;;  %v856_v24 = vmul.f32 %v1859_v22, %v852_v20 }
 0x409   : > { %v868_v26 = vmul.f32 %v1523_v1, %v857_v23 }
 0x40a   : > { %v867_v27 = vmul.f32 %v1523_v1, %v856_v24 }
 0x40b   : > { %v879_v28 = vadd.f32 %v1524_v45, %v868_v26 }
 0x40c   : > { %924 = vperm.xlu1 %1831, %v910_v25   ;;  %v878_v55 = vadd.f32 %v1524_v45, %v867_v27 }
 0x40e   : > { %v1837_v29 = vpack.i.bf16 %v879_v28, %v878_v55  ;;  %v1742_v30 = vpack.c.bf16 %v879_v28, %v878_v55 }
 0x410   : > { %1838 = vrot.lane.b32.xlu0 %v1837_v29, %s1876_s24 }
 0x414   : > { %1848 = vrot.lane.b32.xlu0 %v1837_v29, %s1877_s25 }
 0x418   : > { %919 = vperm.xlu0 %1830, %v909_v56  }
 0x41c   : > { %929 = vperm.xlu0 %1830, %v911_v32  }
 0x472   : > { %v1834_v33 = vpop.permute.xlu1 %1833 }
 0x473   : > { %v1836_v35 = vunpack.i.h.bf16 %v1834_v33  ;;  %v1835_v36 = vunpack.i.l.bf16 %v1834_v33 }
 0x475   : > { %v1726_v37 = vpack.c.bf16 %v1836_v35, %v1835_v36 }
 0x476   : > { %v1844_v42 = vpop.permute.xlu1 %1843 }
 0x477   : > { %1728 = vmatprep.subr.msk.bf16.mxu1 %vm1990_vm2, %v1726_v37  ;;  %v1846_v43 = vunpack.i.h.bf16 %v1844_v42  ;;  %v1845_v44 = vunpack.i.l.bf16 %v1844_v42 }
 0x478   : > { %1731 = vmatpush3.bf16.msk.msra.mxu1 %vm1990_vm2, %v1726_v37 }
 0x479   : > { %v1746_v48 = vpack.c.bf16 %v1846_v43, %v1845_v44 }
 0x482   : > { %v1839_v38 = vpop.permute.xlu0 %1838 }
 0x483   : > { %v1841_v39 = vunpack.i.h.bf16 %v1839_v38  ;;  %v1840_v40 = vunpack.i.l.bf16 %v1839_v38 }
 0x485   : > { %v1732_v41 = vpack.c.bf16 %v1841_v39, %v1840_v40 }
 0x486   : > { %v1849_v47 = vpop.permute.xlu0 %1848 }
 0x487   : > { %1734 = vmatprep.subr.msk.bf16.mxu1 %vm1990_vm2, %v1732_v41  ;;  %v1851_v49 = vunpack.i.h.bf16 %v1849_v47  ;;  %v1850_v50 = vunpack.i.l.bf16 %v1849_v47  ;;  %v915_v59 = vpop.permute.xlu1 %914 }
 0x488   : > { %1737 = vmatpush3.bf16.msk.msra.mxu1 %vm1990_vm2, %v1732_v41 }
 0x489   : > { %1739 = vmatprep.subr.bf16.mxu1 %v1738_v15  ;;  %v1752_v51 = vpack.c.bf16 %v1851_v49, %v1850_v50 }
 0x48b   : > { %v925_v5 = vpop.permute.xlu1 %924 }
 0x48c   : > { %1741 = vmatpush3.bf16.msra.mxu1 %v1738_v15 }
 0x48d   : > { %1743 = vmatprep.subr.bf16.mxu1 %v1742_v30 }
 0x490   : > { %1745 = vmatpush3.bf16.msra.mxu1 %v1742_v30 }
 0x491   : > { %1748 = vmatprep.subr.msk.bf16.mxu1 %vm2003_vm4, %v1746_v48 }
 0x494   : > { %1751 = vmatpush3.bf16.msk.msra.mxu1 %vm2003_vm4, %v1746_v48 }
 0x495   : > { %1754 = vmatprep.subr.msk.bf16.mxu1 %vm2003_vm4, %v1752_v51 }
 0x497   : > { %v920_v34 = vpop.permute.xlu0 %919 }
 0x498   : > { %1757 = vmatpush3.bf16.msk.msra.mxu1 %vm2003_vm4, %v1752_v51 }
 0x49b   : > { %1651 = vmatmul.mubr.msk.f32.vlgmr.msra.gmra.mrb[4].mxu1 %vm465_vm0, %v905_v21  ;;  %v930_v2 = vpop.permute.xlu0 %929 }
 0x49c   : > { %1653 = vmatprep.mubr.msk.f32.mxu1 %vm465_vm0, %v906_v52 }
 0x49f   : > { %1654 = vmatmul.mubr.msk.f32.gmra.mrb[6].mxu1 %vm465_vm0, %v907_v53 }
 0x56e   : > { %v1652_v54 = vpop.f32.mrb[4].mxu1 }
 0x56f   : > { %v1016_v57 = vadd.f32 %v1652_v54, %v920_v34  ;;  %v1010_v58 = vpop.f32.mrb[5].mxu1 }
 0x570   : > { %v1011_v61 = vadd.f32 %v1010_v58, %v915_v59 }
 0x571   : > { %v2278_v60 = vmax.f32 %v1016_v57, 0.0 }
 0x572   : > { %v1655_v62 = vpop.f32.mrb[6].mxu1  ;;  %v2284_v0 = vmax.f32 %v1011_v61, 0.0 }
 0x573   : > { %1055 = vrot.lane.b32.xlu0 %v2278_v60, %s1879_s27  ;;  %1039 = vrot.lane.b32.xlu1 %v2278_v60, %s1876_s24  ;;  %v1020_v63 = vpop.f32.mrb[7].mxu1  ;;  %v1034_v1 = vmul.f32 %v2278_v60, %v2278_v60  ;;  %v1026_v3 = vadd.f32 %v1655_v62, %v930_v2 }
 0x574   : > { %v1033_v4 = vmul.f32 %v2284_v0, %v2284_v0  ;;  %v1021_v7 = vadd.f32 %v1020_v63, %v925_v5 }
 0x575   : > { %v2298_v6 = vmax.f32 %v1026_v3, 0.0 }
 0x576   : > { %v2304_v45 = vmax.f32 %v1021_v7, 0.0 }
 0x577   : > { %1053 = vrot.lane.b32.xlu0 %v2284_v0, %s1879_s27  ;;  %1037 = vrot.lane.b32.xlu1 %v2284_v0, %s1876_s24  ;;  %v1036_v9 = vmul.f32 %v2298_v6, %v2298_v6 }
 0x578   : > { %v1035_v8 = vmul.f32 %v2304_v45, %v2304_v45 }
 0x57b   : > { %1063 = vrot.lane.b32.xlu0 %v1034_v1, %s1879_s27  ;;  %1047 = vrot.lane.b32.xlu1 %v1034_v1, %s1876_s24 }
 0x57f   : > { %1061 = vrot.lane.b32.xlu0 %v1033_v4, %s1879_s27  ;;  %1045 = vrot.lane.b32.xlu1 %v1033_v4, %s1876_s24 }
 0x583   : > { %1059 = vrot.lane.b32.xlu0 %v2298_v6, %s1879_s27  ;;  %1043 = vrot.lane.b32.xlu1 %v2298_v6, %s1876_s24 }
 0x587   : > { %1057 = vrot.lane.b32.xlu0 %v2304_v45, %s1879_s27  ;;  %1041 = vrot.lane.b32.xlu1 %v2304_v45, %s1876_s24 }
 0x58b   : > { %1065 = vrot.lane.b32.xlu0 %v1035_v8, %s1879_s27  ;;  %1049 = vrot.lane.b32.xlu1 %v1035_v8, %s1876_s24 }
 0x58f   : > { %1067 = vrot.lane.b32.xlu0 %v1036_v9, %s1879_s27  ;;  %1051 = vrot.lane.b32.xlu1 %v1036_v9, %s1876_s24 }
 0x5e5   : > { %v1056_v10 = vpop.permute.xlu0 %1055  ;;  %v1040_v46 = vpop.permute.xlu1 %1039 }
 0x5e6   : > { %v1070_v11 = vsel %vm603_vm5, %v1040_v46, %v1056_v10 }
 0x5e7   : > { %v1078_v12 = vadd.f32 %v1070_v11, %v2278_v60 }
 0x5e9   : > { %v1054_v13 = vpop.permute.xlu0 %1053  ;;  %v1038_v14 = vpop.permute.xlu1 %1037  ;;  %1103 = vrot.lane.b32.xlu0 %v1078_v12, %s1881_s29  ;;  %1087 = vrot.lane.b32.xlu1 %v1078_v12, %s1880_s28 }
 0x5ea   : > { %v1069_v15 = vsel %vm603_vm5, %v1038_v14, %v1054_v13 }
 0x5eb   : > { %v1077_v16 = vadd.f32 %v1069_v15, %v2284_v0 }
 0x5ed   : > { %v1064_v18 = vpop.permute.xlu0 %1063  ;;  %v1048_v19 = vpop.permute.xlu1 %1047  ;;  %1101 = vrot.lane.b32.xlu0 %v1077_v16, %s1881_s29  ;;  %1085 = vrot.lane.b32.xlu1 %v1077_v16, %s1880_s28 }
 0x5ee   : > { %v1074_v20 = vsel %vm603_vm5, %v1048_v19, %v1064_v18 }
 0x5ef   : > { %v1082_v22 = vadd.f32 %v1074_v20, %v1034_v1 }
 0x5f1   : > { %1111 = vrot.lane.b32.xlu0 %v1082_v22, %s1881_s29  ;;  %v1062_v23 = vpop.permute.xlu0 %1061  ;;  %1095 = vrot.lane.b32.xlu1 %v1082_v22, %s1880_s28  ;;  %v1046_v24 = vpop.permute.xlu1 %1045 }
 0x5f2   : > { %v1073_v25 = vsel %vm603_vm5, %v1046_v24, %v1062_v23 }
 0x5f3   : > { %v1081_v26 = vadd.f32 %v1073_v25, %v1033_v4 }
 0x5f5   : > { %v1060_v27 = vpop.permute.xlu0 %1059  ;;  %1109 = vrot.lane.b32.xlu0 %v1081_v26, %s1881_s29  ;;  %1093 = vrot.lane.b32.xlu1 %v1081_v26, %s1880_s28  ;;  %v1044_v28 = vpop.permute.xlu1 %1043 }
 0x5f6   : > { %v1072_v55 = vsel %vm603_vm5, %v1044_v28, %v1060_v27 }
 0x5f7   : > { %v1080_v29 = vadd.f32 %v1072_v55, %v2298_v6 }
 0x5f9   : > { %v1058_v30 = vpop.permute.xlu0 %1057  ;;  %1107 = vrot.lane.b32.xlu0 %v1080_v29, %s1881_s29  ;;  %1091 = vrot.lane.b32.xlu1 %v1080_v29, %s1880_s28  ;;  %v1042_v56 = vpop.permute.xlu1 %1041 }
 0x5fa   : > { %v1071_v31 = vsel %vm603_vm5, %v1042_v56, %v1058_v30 }
 0x5fb   : > { %v1079_v32 = vadd.f32 %v1071_v31, %v2304_v45 }
 0x5fd   : > { %v1066_v33 = vpop.permute.xlu0 %1065  ;;  %1105 = vrot.lane.b32.xlu0 %v1079_v32, %s1881_s29  ;;  %1089 = vrot.lane.b32.xlu1 %v1079_v32, %s1880_s28  ;;  %v1050_v35 = vpop.permute.xlu1 %1049 }
 0x5fe   : > { %v1075_v36 = vsel %vm603_vm5, %v1050_v35, %v1066_v33 }
 0x5ff   : > { %v1083_v37 = vadd.f32 %v1075_v36, %v1035_v8 }
 0x601   : > { %v1068_v38 = vpop.permute.xlu0 %1067  ;;  %1113 = vrot.lane.b32.xlu0 %v1083_v37, %s1881_s29  ;;  %1097 = vrot.lane.b32.xlu1 %v1083_v37, %s1880_s28  ;;  %v1052_v39 = vpop.permute.xlu1 %1051 }
 0x602   : > { %v1076_v40 = vsel %vm603_vm5, %v1052_v39, %v1068_v38 }
 0x603   : > { %v1084_v41 = vadd.f32 %v1076_v40, %v1036_v9 }
 0x605   : > { %1115 = vrot.lane.b32.xlu0 %v1084_v41, %s1881_s29  ;;  %1099 = vrot.lane.b32.xlu1 %v1084_v41, %s1880_s28 }
 0x65b   : > { %v1104_v42 = vpop.permute.xlu0 %1103  ;;  %v1088_v43 = vpop.permute.xlu1 %1087 }
 0x65c   : > { %v1118_v44 = vsel %vm654_vm6, %v1088_v43, %v1104_v42 }
 0x65d   : > { %v1126_v47 = vadd.f32 %v1118_v44, %v1078_v12 }
 0x65f   : > { %v1102_v48 = vpop.permute.xlu0 %1101  ;;  %1151 = vrot.lane.b32.xlu0 %v1126_v47, %s1883_s12  ;;  %1135 = vrot.lane.b32.xlu1 %v1126_v47, %s1882_s30  ;;  %v1086_v49 = vpop.permute.xlu1 %1085 }
 0x660   : > { %v1117_v50 = vsel %vm654_vm6, %v1086_v49, %v1102_v48  ;;  %v1331_v49 = vld [vmem:[%s2596_s9] sm:$0xff] }
 0x661   : > { %v1125_v51 = vadd.f32 %v1117_v50, %v1077_v16  ;;  %v1332_v50 = vld [vmem:[%s2596_s9 + $0x8] sm:$0xff] }
 0x663   : > { %v1112_v21 = vpop.permute.xlu0 %1111  ;;  %1149 = vrot.lane.b32.xlu0 %v1125_v51, %s1883_s12  ;;  %1133 = vrot.lane.b32.xlu1 %v1125_v51, %s1882_s30  ;;  %v1096_v52 = vpop.permute.xlu1 %1095 }
 0x664   : > { %v1122_v53 = vsel %vm654_vm6, %v1096_v52, %v1112_v21  ;;  %v1333_v21 = vld [vmem:[%s2596_s9 + $0x10] sm:$0xff]  ;;  %v1334_v52 = vld [vmem:[%s2596_s9 + $0x18] sm:$0xff] }
 0x665   : > { %v1130_v34 = vadd.f32 %v1122_v53, %v1082_v22 }
 0x667   : > { %v1110_v54 = vpop.permute.xlu0 %1109  ;;  %1159 = vrot.lane.b32.xlu0 %v1130_v34, %s1883_s12  ;;  %1143 = vrot.lane.b32.xlu1 %v1130_v34, %s1882_s30  ;;  %v1094_v57 = vpop.permute.xlu1 %1093 }
 0x668   : > { %v1121_v58 = vsel %vm654_vm6, %v1094_v57, %v1110_v54  ;;  %v1762_v54 = vpack.c.bf16 %v1334_v52, %v1333_v21 }
 0x669   : > { %v1129_v59 = vadd.f32 %v1121_v58, %v1081_v26 }
 0x66b   : > { %v1108_v61 = vpop.permute.xlu0 %1107  ;;  %1157 = vrot.lane.b32.xlu0 %v1129_v59, %s1883_s12  ;;  %1141 = vrot.lane.b32.xlu1 %v1129_v59, %s1882_s30  ;;  %v1092_v62 = vpop.permute.xlu1 %1091 }
 0x66c   : > { %v1120_v63 = vsel %vm654_vm6, %v1092_v62, %v1108_v61  ;;  %v1336_v61 = vld [vmem:[%s2596_s9 + $0x28] sm:$0xff] }
 0x66d   : > { %v1128_v1 = vadd.f32 %v1120_v63, %v1080_v29 }
 0x66f   : > { %v1106_v2 = vpop.permute.xlu0 %1105  ;;  %1155 = vrot.lane.b32.xlu0 %v1128_v1, %s1883_s12  ;;  %1139 = vrot.lane.b32.xlu1 %v1128_v1, %s1882_s30  ;;  %v1090_v3 = vpop.permute.xlu1 %1089 }
 0x670   : > { %v1119_v4 = vsel %vm654_vm6, %v1090_v3, %v1106_v2 }
 0x671   : > { %v1127_v5 = vadd.f32 %v1119_v4, %v1079_v32  ;;  %v1337_v4 = vld [vmem:[%s2596_s9 + $0x30] sm:$0xff] }
 0x673   : > { %v1114_v7 = vpop.permute.xlu0 %1113  ;;  %1153 = vrot.lane.b32.xlu0 %v1127_v5, %s1883_s12  ;;  %1137 = vrot.lane.b32.xlu1 %v1127_v5, %s1882_s30  ;;  %v1098_v8 = vpop.permute.xlu1 %1097 }
 0x674   : > { %v1123_v9 = vsel %vm654_vm6, %v1098_v8, %v1114_v7 }
 0x675   : > { %v1131_v10 = vadd.f32 %v1123_v9, %v1083_v37 }
 0x677   : > { %v1116_v46 = vpop.permute.xlu0 %1115  ;;  %1161 = vrot.lane.b32.xlu0 %v1131_v10, %s1883_s12  ;;  %1145 = vrot.lane.b32.xlu1 %v1131_v10, %s1882_s30  ;;  %v1100_v11 = vpop.permute.xlu1 %1099 }
 0x678   : > { %v1124_v12 = vsel %vm654_vm6, %v1100_v11, %v1116_v46  ;;  %v1339_v11 = vld [vmem:[%s2596_s9 + $0x40] sm:$0xff] }
 0x679   : > { %v1132_v13 = vadd.f32 %v1124_v12, %v1084_v41  ;;  %v1340_v12 = vld [vmem:[%s2596_s9 + $0x48] sm:$0xff] }
 0x67b   : > { %1163 = vrot.lane.b32.xlu0 %v1132_v13, %s1883_s12  ;;  %1147 = vrot.lane.b32.xlu1 %v1132_v13, %s1882_s30 }
 0x6d1   : > { %v1152_v14 = vpop.permute.xlu0 %1151  ;;  %v1136_v15 = vpop.permute.xlu1 %1135 }
 0x6d2   : > { %v1166_v16 = vsel %vm705_vm7, %v1136_v15, %v1152_v14  ;;  %v1774_v15 = vpack.c.bf16 %v1340_v12, %v1339_v11 }
 0x6d3   : > { %v1174_v18 = vadd.f32 %v1166_v16, %v1126_v47 }
 0x6d5   : > { %v1150_v19 = vpop.permute.xlu0 %1149  ;;  %1199 = vrot.lane.b32.xlu0 %v1174_v18, %s1885_s14  ;;  %1183 = vrot.lane.b32.xlu1 %v1174_v18, %s1884_s13  ;;  %v1134_v20 = vpop.permute.xlu1 %1133 }
 0x6d6   : > { %v1165_v22 = vsel %vm705_vm7, %v1134_v20, %v1150_v19  ;;  %v1341_v19 = vld [vmem:[%s2596_s9 + $0x50] sm:$0xff]  ;;  %v1342_v20 = vld [vmem:[%s2596_s9 + $0x58] sm:$0xff] }
 0x6d7   : > { %v1173_v23 = vadd.f32 %v1165_v22, %v1125_v51  ;;  %v1758_v51 = vpack.c.bf16 %v1332_v50, %v1331_v49 }
 0x6d9   : > { %v1160_v24 = vpop.permute.xlu0 %1159  ;;  %1197 = vrot.lane.b32.xlu0 %v1173_v23, %s1885_s14  ;;  %1181 = vrot.lane.b32.xlu1 %v1173_v23, %s1884_s13  ;;  %v1144_v25 = vpop.permute.xlu1 %1143 }
 0x6da   : > { %v1170_v26 = vsel %vm705_vm7, %v1144_v25, %v1160_v24  ;;  %1759 = vmatprep.subr.bf16.mxu0 %v1758_v51  ;;  %v1778_v24 = vpack.c.bf16 %v1342_v20, %v1341_v19 }
 0x6db   : > { %v2396_v27 = vadd.f32 %v1170_v26, %v1130_v34  ;;  %1761 = vmatpush3.bf16.msra.mxu0 %v1758_v51 }
 0x6dc   : > { %1763 = vmatprep.subr.bf16.mxu0 %v1762_v54 }
 0x6dd   : > { %v1158_v28 = vpop.permute.xlu0 %1157  ;;  %1207 = vrot.lane.b32.xlu0 %v2396_v27, %s1885_s14  ;;  %1191 = vrot.lane.b32.xlu1 %v2396_v27, %s1884_s13  ;;  %v1142_v55 = vpop.permute.xlu1 %1141 }
 0x6de   : > { %v1169_v29 = vsel %vm705_vm7, %v1142_v55, %v1158_v28  ;;  %v1344_v28 = vld [vmem:[%s2596_s9 + $0x68] sm:$0xff] }
 0x6df   : > { %v2404_v30 = vadd.f32 %v1169_v29, %v1129_v59  ;;  %1765 = vmatpush3.bf16.msra.mxu0 %v1762_v54  ;;  %v1335_v59 = vld [vmem:[%s2596_s9 + $0x20] sm:$0xff] }
 0x6e1   : > { %v1156_v56 = vpop.permute.xlu0 %1155  ;;  %1205 = vrot.lane.b32.xlu0 %v2404_v30, %s1885_s14  ;;  %1189 = vrot.lane.b32.xlu1 %v2404_v30, %s1884_s13  ;;  %v1140_v31 = vpop.permute.xlu1 %1139 }
 0x6e2   : > { %v1168_v32 = vsel %vm705_vm7, %v1140_v31, %v1156_v56 }
 0x6e3   : > { %v2412_v33 = vadd.f32 %v1168_v32, %v1128_v1  ;;  %v1766_v1 = vpack.c.bf16 %v1336_v61, %v1335_v59  ;;  %v1345_v32 = vld [vmem:[%s2596_s9 + $0x70] sm:$0xff] }
 0x6e5   : > { %v1154_v35 = vpop.permute.xlu0 %1153  ;;  %1203 = vrot.lane.b32.xlu0 %v2412_v33, %s1885_s14  ;;  %1187 = vrot.lane.b32.xlu1 %v2412_v33, %s1884_s13  ;;  %v1138_v36 = vpop.permute.xlu1 %1137 }
 0x6e6   : > { %v1167_v37 = vsel %vm705_vm7, %v1138_v36, %v1154_v35  ;;  %1767 = vmatprep.subr.bf16.mxu0 %v1766_v1 }
 0x6e7   : > { %v2420_v38 = vadd.f32 %v1167_v37, %v1127_v5  ;;  %1769 = vmatpush3.bf16.msra.mxu0 %v1766_v1  ;;  %v1338_v5 = vld [vmem:[%s2596_s9 + $0x38] sm:$0xff] }
 0x6e8   : > { %v1770_v9 = vpack.c.bf16 %v1338_v5, %v1337_v4 }
 0x6e9   : > { %v1162_v39 = vpop.permute.xlu0 %1161  ;;  %1201 = vrot.lane.b32.xlu0 %v2420_v38, %s1885_s14  ;;  %1185 = vrot.lane.b32.xlu1 %v2420_v38, %s1884_s13  ;;  %v1146_v40 = vpop.permute.xlu1 %1145 }
 0x6ea   : > { %v1171_v41 = vsel %vm705_vm7, %v1146_v40, %v1162_v39  ;;  %1771 = vmatprep.subr.bf16.mxu0 %v1770_v9 }
 0x6eb   : > { %v2428_v42 = vadd.f32 %v1171_v41, %v1131_v10  ;;  %1773 = vmatpush3.bf16.msra.mxu0 %v1770_v9 }
 0x6ec   : > { %1775 = vmatprep.subr.bf16.mxu0 %v1774_v15 }
 0x6ed   : > { %v1164_v43 = vpop.permute.xlu0 %1163  ;;  %1209 = vrot.lane.b32.xlu0 %v2428_v42, %s1885_s14  ;;  %1193 = vrot.lane.b32.xlu1 %v2428_v42, %s1884_s13  ;;  %v1148_v44 = vpop.permute.xlu1 %1147 }
 0x6ee   : > { %v1172_v47 = vsel %vm705_vm7, %v1148_v44, %v1164_v43 }
 0x6ef   : > { %v2436_v48 = vadd.f32 %v1172_v47, %v1132_v13  ;;  %1777 = vmatpush3.bf16.msra.mxu0 %v1774_v15  ;;  %v1539_v47 = vld [vmem:[#allocation2] ss:$0 sm:$0xff] }
 0x6f0   : > { %1779 = vmatprep.subr.bf16.mxu0 %v1778_v24 }
 0x6f1   : > { %1211 = vrot.lane.b32.xlu0 %v2436_v48, %s1885_s14  ;;  %1195 = vrot.lane.b32.xlu1 %v2436_v48, %s1884_s13 }
 0x6f3   : > { %1781 = vmatpush3.bf16.msra.mxu0 %v1778_v24 }
 0x747   : > { %v1200_v53 = vpop.permute.xlu0 %1199  ;;  %v1184_v34 = vpop.permute.xlu1 %1183 }
 0x748   : > { %v1214_v57 = vsel %vm756_vm8, %v1184_v34, %v1200_v53 }
 0x749   : > { %v2456_v58 = vadd.f32 %v1214_v57, %v1174_v18 }
 0x74b   : > { %v1198_v62 = vpop.permute.xlu0 %1197  ;;  %1247 = vrot.lane.b32.xlu0 %v2456_v58, %s1887_s16  ;;  %1231 = vrot.lane.b32.xlu1 %v2456_v58, %s1886_s15  ;;  %v1182_v63 = vpop.permute.xlu1 %1181 }
 0x74c   : > { %v1213_v2 = vsel %vm756_vm8, %v1182_v63, %v1198_v62 }
 0x74d   : > { %v2470_v3 = vadd.f32 %v1213_v2, %v1173_v23 }
 0x74f   : > { %v1208_v7 = vpop.permute.xlu0 %1207  ;;  %1245 = vrot.lane.b32.xlu0 %v2470_v3, %s1887_s16  ;;  %1229 = vrot.lane.b32.xlu1 %v2470_v3, %s1886_s15  ;;  %v1192_v8 = vpop.permute.xlu1 %1191 }
 0x750   : > { %v1218_v10 = vsel %vm756_vm8, %v1192_v8, %v1208_v7 }
 0x751   : > { %v2485_v46 = vadd.f32 %v1218_v10, %v2396_v27  ;;  %v1343_v27 = vld [vmem:[%s2596_s9 + $0x60] sm:$0xff] }
 0x753   : > { %v1206_v13 = vpop.permute.xlu0 %1205  ;;  %1255 = vrot.lane.b32.xlu0 %v2485_v46, %s1887_s16  ;;  %1239 = vrot.lane.b32.xlu1 %v2485_v46, %s1886_s15  ;;  %v1190_v14 = vpop.permute.xlu1 %1189 }
 0x754   : > { %v1217_v16 = vsel %vm756_vm8, %v1190_v14, %v1206_v13 }
 0x755   : > { %v2500_v18 = vadd.f32 %v1217_v16, %v2404_v30  ;;  %v1782_v30 = vpack.c.bf16 %v1344_v28, %v1343_v27 }
 0x757   : > { %v1204_v22 = vpop.permute.xlu0 %1203  ;;  %1253 = vrot.lane.b32.xlu0 %v2500_v18, %s1887_s16  ;;  %1237 = vrot.lane.b32.xlu1 %v2500_v18, %s1886_s15  ;;  %v1188_v23 = vpop.permute.xlu1 %1187 }
 0x758   : > { %v1216_v25 = vsel %vm756_vm8, %v1188_v23, %v1204_v22  ;;  %1783 = vmatprep.subr.bf16.mxu0 %v1782_v30 }
 0x759   : > { %v2515_v26 = vadd.f32 %v1216_v25, %v2412_v33  ;;  %1785 = vmatpush3.bf16.msra.mxu0 %v1782_v30  ;;  %v1346_v33 = vld [vmem:[%s2596_s9 + $0x78] sm:$0xff] }
 0x75a   : > { %v1786_v37 = vpack.c.bf16 %v1346_v33, %v1345_v32 }
 0x75b   : > { %v1202_v55 = vpop.permute.xlu0 %1201  ;;  %1251 = vrot.lane.b32.xlu0 %v2515_v26, %s1887_s16  ;;  %1235 = vrot.lane.b32.xlu1 %v2515_v26, %s1886_s15  ;;  %v1186_v29 = vpop.permute.xlu1 %1185 }
 0x75c   : > { %v1215_v56 = vsel %vm756_vm8, %v1186_v29, %v1202_v55  ;;  %1787 = vmatprep.subr.bf16.mxu0 %v1786_v37 }
 0x75d   : > { %v1223_v31 = vadd.f32 %v1215_v56, %v2420_v38  ;;  %1789 = vmatpush3.bf16.msra.mxu0 %v1786_v37  ;;  %v1537_v37 = vld [vmem:[%s2594_s7] ss:$0 sm:$0xff] }
 0x75f   : > { %v1210_v35 = vpop.permute.xlu0 %1209  ;;  %1249 = vrot.lane.b32.xlu0 %v1223_v31, %s1887_s16  ;;  %1233 = vrot.lane.b32.xlu1 %v1223_v31, %s1886_s15  ;;  %v1194_v36 = vpop.permute.xlu1 %1193 }
 0x760   : > { %v1219_v38 = vsel %vm756_vm8, %v1194_v36, %v1210_v35 }
 0x761   : > { %v1227_v39 = vadd.f32 %v1219_v38, %v2428_v42 }
 0x763   : > { %v1212_v40 = vpop.permute.xlu0 %1211  ;;  %1257 = vrot.lane.b32.xlu0 %v1227_v39, %s1887_s16  ;;  %1241 = vrot.lane.b32.xlu1 %v1227_v39, %s1886_s15  ;;  %v1196_v41 = vpop.permute.xlu1 %1195 }
 0x764   : > { %v1220_v43 = vsel %vm756_vm8, %v1196_v41, %v1212_v40 }
 0x765   : > { %v1228_v44 = vadd.f32 %v1220_v43, %v2436_v48 }
 0x767   : > { %1259 = vrot.lane.b32.xlu0 %v1228_v44, %s1887_s16  ;;  %1243 = vrot.lane.b32.xlu1 %v1228_v44, %s1886_s15 }
 0x76b   : > { %1354 = vperm.xlu1 %1831, %v1539_v47  }
 0x7bd   : > { %v1248_v42 = vpop.permute.xlu0 %1247  ;;  %v1232_v49 = vpop.permute.xlu1 %1231 }
 0x7be   : > { %v1262_v50 = vsel %vm807_vm9, %v1232_v49, %v1248_v42 }
 0x7bf   : > { %v1270_v51 = vadd.f32 %v1262_v50, %v2456_v58 }
 0x7c1   : > { %v1246_v21 = vpop.permute.xlu0 %1245  ;;  %v1230_v52 = vpop.permute.xlu1 %1229  ;;  %v1278_v34 = vmul.f32 0.03125, %v1270_v51 }
 0x7c2   : > { %v1261_v53 = vsel %vm807_vm9, %v1230_v52, %v1246_v21 }
 0x7c3   : > { %v1269_v48 = vadd.f32 %v1261_v53, %v2470_v3  ;;  %v1286_v62 = vmul.f32 %v1278_v34, %v1278_v34  ;;  %v1302_v28 = vsub.f32 %v2278_v60, %v1278_v34 }
 0x7c5   : > { %v1256_v54 = vpop.permute.xlu0 %1255  ;;  %v1240_v57 = vpop.permute.xlu1 %1239  ;;  %v1277_v63 = vmul.f32 0.03125, %v1269_v48 }
 0x7c6   : > { %v1266_v59 = vsel %vm807_vm9, %v1240_v57, %v1256_v54 }
 0x7c7   : > { %v1274_v61 = vadd.f32 %v1266_v59, %v2485_v46  ;;  %v1285_v8 = vmul.f32 %v1277_v63, %v1277_v63  ;;  %v1301_v36 = vsub.f32 %v2284_v0, %v1277_v63 }
 0x7c9   : > { %v1282_v1 = vmul.f32 0.03125, %v1274_v61  ;;  %v1254_v2 = vpop.permute.xlu0 %1253  ;;  %v1238_v58 = vpop.permute.xlu1 %1237 }
 0x7ca   : > { %v1265_v4 = vsel %vm807_vm9, %v1238_v58, %v1254_v2 }
 0x7cb   : > { %v1290_v5 = vsub.f32 %v1282_v1, %v1286_v62  ;;  %v1273_v7 = vadd.f32 %v1265_v4, %v2500_v18 }
 0x7cd   : > { %v1294_v3 = vadd.f32 1e-05, %v1290_v5  ;;  %v1281_v9 = vmul.f32 0.03125, %v1273_v7  ;;  %v1252_v10 = vpop.permute.xlu0 %1251  ;;  %v1236_v11 = vpop.permute.xlu1 %1235 }
 0x7ce   : > { %v1264_v15 = vsel %vm807_vm9, %v1236_v11, %v1252_v10 }
 0x7cf   : > { %1860 = vrsqrt.f32 %v1294_v3  ;;  %v1289_v12 = vsub.f32 %v1281_v9, %v1285_v8  ;;  %v1272_v18 = vadd.f32 %v1264_v15, %v2515_v26 }
 0x7d1   : > { %v1293_v13 = vadd.f32 1e-05, %v1289_v12  ;;  %v1250_v46 = vpop.permute.xlu0 %1249  ;;  %v1234_v14 = vpop.permute.xlu1 %1233  ;;  %v1280_v55 = vmul.f32 0.03125, %v1272_v18 }
 0x7d2   : > { %v1263_v16 = vsel %vm807_vm9, %v1234_v14, %v1250_v46 }
 0x7d3   : > { %1862 = vrsqrt.f32 %v1293_v13  ;;  %v1271_v19 = vadd.f32 %v1263_v16, %v1223_v31  ;;  %v1304_v52 = vsub.f32 %v2298_v6, %v1280_v55 }
 0x7d5   : > { %v1279_v20 = vmul.f32 0.03125, %v1271_v19  ;;  %v1258_v22 = vpop.permute.xlu0 %1257  ;;  %v1242_v23 = vpop.permute.xlu1 %1241 }
 0x7d6   : > { %v1267_v24 = vsel %vm807_vm9, %v1242_v23, %v1258_v22 }
 0x7d7   : > { %v1275_v25 = vadd.f32 %v1267_v24, %v1227_v39  ;;  %v1287_v29 = vmul.f32 %v1279_v20, %v1279_v20  ;;  %v1288_v39 = vmul.f32 %v1280_v55, %v1280_v55  ;;  %v1303_v50 = vsub.f32 %v2304_v45, %v1279_v20 }
 0x7d9   : > { %v1861_v27 = vpop.eup %1860  ;;  %v1283_v30 = vmul.f32 0.03125, %v1275_v25  ;;  %v1260_v56 = vpop.permute.xlu0 %1259 }
 0x7da   : > { %v1244_v32 = vpop.permute.xlu1 %1243  ;;  %v1306_v35 = vmul.f32 %v1861_v27, %v1302_v28 }
 0x7db   : > { %v1268_v31 = vsel %vm807_vm9, %v1244_v32, %v1260_v56  ;;  %v1291_v33 = vsub.f32 %v1283_v30, %v1287_v29 }
 0x7dc   : > { %v1276_v26 = vadd.f32 %v1268_v31, %v1228_v44  ;;  %v1317_v47 = vmul.f32 %v1537_v37, %v1306_v35 }
 0x7dd   : > { %v1863_v38 = vpop.eup %1862  ;;  %v1295_v60 = vadd.f32 1e-05, %v1291_v33 }
 0x7de   : > { %v1284_v40 = vmul.f32 0.03125, %v1276_v26  ;;  %v1305_v41 = vmul.f32 %v1863_v38, %v1301_v36  ;;  %v1328_v0 = vadd.f32 %v1538_v17, %v1317_v47 }
 0x7df   : > { %1864 = vrsqrt.f32 %v1295_v60 }
 0x7e0   : > { %v1292_v43 = vsub.f32 %v1284_v40, %v1288_v39  ;;  %v1316_v42 = vmul.f32 %v1537_v37, %v1305_v41 }
 0x7e2   : > { %v1296_v44 = vadd.f32 1e-05, %v1292_v43  ;;  %v1327_v49 = vadd.f32 %v1538_v17, %v1316_v42 }
 0x7e4   : > { %1866 = vrsqrt.f32 %v1296_v44  ;;  %1688 = vmatprep.mubr.f32.mxu0 %v1327_v49 }
 0x7e5   : > { %1689 = vmatmul.mubr.f32.vlgmr.msra.gmra.mrb[0].mxu0 %v1328_v0 }
 0x7e9   : > { %v1865_v51 = vpop.eup %1864 }
 0x7ea   : > { %v1307_v21 = vmul.f32 %v1865_v51, %v1303_v50  ;;  %v1355_v61 = vpop.permute.xlu1 %1354 }
 0x7ec   : > { %v1318_v53 = vmul.f32 %v1537_v37, %v1307_v21 }
 0x7ee   : > { %v1867_v34 = vpop.eup %1866  ;;  %v1329_v48 = vadd.f32 %v1538_v17, %v1318_v53 }
 0x7ef   : > { %v1308_v54 = vmul.f32 %v1867_v34, %v1304_v52 }
 0x7f0   : > { %1691 = vmatprep.mubr.f32.mxu0 %v1329_v48 }
 0x7f1   : > { %v1319_v57 = vmul.f32 %v1537_v37, %v1308_v54 }
 0x7f3   : > { %v1330_v59 = vadd.f32 %v1538_v17, %v1319_v57 }
 0x7f5   : > { %1692 = vmatmul.mubr.f32.gmra.mrb[2].mxu0 %v1330_v59 }
 0x8b8   : > { %v1690_v62 = vpop.f32.mrb[0].mxu0 }
 0x8b9   : > { %v1429_v45 = vadd.f32 %v1690_v62, %v1355_v61  ;;  %v1423_v63 = vpop.f32.mrb[1].mxu0 }
 0x8ba   : > { %v1424_v1 = vadd.f32 %v1423_v63, %v1355_v61 }
 0x8bb   : > { %1444 = vst.msk [vmem:[%s388_s18 + $0x8] sm:$0xff] %vm1442_vm10, %v1429_v45 }
 0x8bc   : > { %1443 = vst.msk [vmem:[%s388_s18] sm:$0xff] %vm1442_vm10, %v1424_v1 }
 0x8c8   : > { %v1693_v6 = vpop.f32.mrb[2].mxu0 }
 0x8c9   : > { %v1439_v2 = vadd.f32 %v1693_v6, %v1355_v61  ;;  %v1433_v58 = vpop.f32.mrb[3].mxu0 }
 0x8ca   : > { %v1434_v4 = vadd.f32 %v1433_v58, %v1355_v61 }
 0x8cb   : > { %1446 = vst.msk [vmem:[%s388_s18 + $0x18] sm:$0xff] %vm1442_vm10, %v1439_v2 }
 0x8cc   : > { %1445 = vst.msk [vmem:[%s388_s18 + $0x10] sm:$0xff] %vm1442_vm10, %v1434_v4 }
 0x8cd PF: > { %s23_s19 = sadd.s32 1, %s1874_s19  }
 0x8ce   : > { %p20_p4 = scmp.ge.s32.totalorder %s23_s19, 4  }
 0x8d0   :  { %22 = sbr.rel (!%p20_p4) target bundleno = 3 (0x3), region = 94 }

</bundles_post_ra>
